<compile_context>
chip_gen: v7x
topology: tpu7x:2x2x1
jax: 0.10.0
libtpu: 0.0.40
codegen_flags: <defaults>
</compile_context>

<pallas_src>
import functools

import jax
import jax.numpy as jnp
from jax.experimental import pallas as pl
from jax.experimental.pallas import tpu as pltpu


def _round_up(x, m):
    return ((x + m - 1) // m) * m


# ----------------------------------------------------------------------------
# Pallas kernel: tiled matmul with K-accumulation, fused bias (+ optional ReLU)
# applied once per output tile in the finalize branch.
# ----------------------------------------------------------------------------
def _gemm_bias_kernel(a_ref, b_ref, bias_ref, o_ref, acc_ref, *, apply_relu):
    k = pl.program_id(2)

    @pl.when(k == 0)
    def _init():
        acc_ref[...] = jnp.zeros_like(acc_ref)

    acc_ref[...] += jnp.dot(a_ref[...], b_ref[...],
                            preferred_element_type=jnp.float32)

    @pl.when(k == pl.num_programs(2) - 1)
    def _finalize():
        out = acc_ref[...] + bias_ref[...]      # (tm,tn) + (1,tn) or (tm,1)
        if apply_relu:
            out = jnp.maximum(out, 0.0)
        o_ref[...] = out.astype(o_ref.dtype)


def gemm_bias_act(a, b, bias, *, relu, bias_axis, tm=256, tn=256, tk=512):
    """out = act(a @ b + bias), tiled Pallas GEMM.

    a: (M, K) f32, b: (K, N) f32.
    bias_axis=1 -> bias shape (N,) broadcast over rows (FC layers).
    bias_axis=0 -> bias shape (M,) broadcast over columns (transposed conv GEMM).
    """
    M, K = a.shape
    Kb, N = b.shape
    assert K == Kb

    # Clamp tiles to (padded) problem size; keep (8, 128) alignment.
    tm = min(tm, _round_up(M, 8))
    tn = min(tn, _round_up(N, 128))
    tk = min(tk, _round_up(K, 128))
    Mp, Np, Kp = _round_up(M, tm), _round_up(N, tn), _round_up(K, tk)

    a_p = jnp.pad(a, ((0, Mp - M), (0, Kp - K)))
    b_p = jnp.pad(b, ((0, Kp - K), (0, Np - N)))
    if bias_axis == 1:
        bias_p = jnp.pad(bias.reshape(1, N), ((0, 0), (0, Np - N)))
        bias_spec = pl.BlockSpec((1, tn), lambda i, j, k: (0, j))
    else:
        bias_p = jnp.pad(bias.reshape(M, 1), ((0, Mp - M), (0, 0)))
        bias_spec = pl.BlockSpec((tm, 1), lambda i, j, k: (i, 0))

    grid = (Mp // tm, Np // tn, Kp // tk)
    kern = functools.partial(_gemm_bias_kernel, apply_relu=relu)

    out = pl.pallas_call(
        kern,
        out_shape=jax.ShapeDtypeStruct((Mp, Np), jnp.float32),
        grid=grid,
        in_specs=[
            pl.BlockSpec((tm, tk), lambda i, j, k: (i, k)),
            pl.BlockSpec((tk, tn), lambda i, j, k: (k, j)),
            bias_spec,
        ],
        out_specs=pl.BlockSpec((tm, tn), lambda i, j, k: (i, j)),
        scratch_shapes=[pltpu.VMEM((tm, tn), jnp.float32)],
        compiler_params=pltpu.CompilerParams(
            dimension_semantics=("parallel", "parallel", "arbitrary"),
            vmem_limit_bytes=32 * 1024 * 1024,   # safe on v7x (64 MiB phys) too
        ),
    )(a_p, b_p, bias_p)
    return out[:M, :N]


# ----------------------------------------------------------------------------
# Conv3d = im2col (XLA glue) + lane-dense Pallas GEMM:  out^T = W @ cols^T + b
# ----------------------------------------------------------------------------
def conv3d_relu(x, w, b, stride, padding, *, relu=True):
    """x: (N, Cin, D, H, W); w: (Cout, Cin, kD, kH, kW); b: (Cout,)."""
    Nb, Cin, D, H, W = x.shape
    Cout, _, kD, kH, kW = w.shape
    sD, sH, sW = stride
    pD, pH, pW = padding

    xp = jnp.pad(x, ((0, 0), (0, 0), (pD, pD), (pH, pH), (pW, pW)))
    Dp, Hp, Wp = D + 2 * pD, H + 2 * pH, W + 2 * pW
    Do = (Dp - kD) // sD + 1
    Ho = (Hp - kH) // sH + 1
    Wo = (Wp - kW) // sW + 1

    # TODO(synk): fuse this im2col gather into the GEMM pipeline (manual DMA /
    # index_map over taps) to avoid the kD*kH*kW HBM blow-up at large
    # resolutions; here XLA materializes cols^T once.
    taps = []
    for kd in range(kD):
        for kh in range(kH):
            for kw_ in range(kW):
                taps.append(xp[:, :,
                               kd:kd + sD * Do:sD,
                               kh:kh + sH * Ho:sH,
                               kw_:kw_ + sW * Wo:sW])   # (N, Cin, Do, Ho, Wo)
    p = jnp.stack(taps, axis=0).reshape(kD, kH, kW, Nb, Cin, Do, Ho, Wo)
    # K axis ordered (Cin, kD, kH, kW) to match PyTorch weight flattening;
    # lane axis is M = N*Do*Ho*Wo -> lane-dense GEMM output.
    colsT = p.transpose(4, 0, 1, 2, 3, 5, 6, 7).reshape(
        Cin * kD * kH * kW, Nb * Do * Ho * Wo)          # (K, M)

    wm = w.reshape(Cout, Cin * kD * kH * kW)            # (Cout, K)
    outT = gemm_bias_act(wm, colsT, b, relu=relu, bias_axis=0)   # (Cout, M)
    out = outT.reshape(Cout, Nb, Do, Ho, Wo).transpose(1, 0, 2, 3, 4)
    return out                                          # (N, Cout, Do, Ho, Wo)


# ----------------------------------------------------------------------------
# Network forward
# ----------------------------------------------------------------------------
def network_forward(x, params):
    x = conv3d_relu(x, params["w1"], params["b1"], (1, 2, 2), (0, 2, 2))
    x = conv3d_relu(x, params["w2"], params["b2"], (1, 2, 2), (0, 1, 1))
    x = conv3d_relu(x, params["w3"], params["b3"], (1, 2, 2), (0, 1, 1))
    x = x.reshape(x.shape[0], -1)                       # NCDHW flatten, like .view()
    # FC weights stored pre-transposed: (in, out). Output last dim 512 / 1.
    x = gemm_bias_act(x, params["fc1_w"], params["fc1_b"], relu=True, bias_axis=1)
    x = gemm_bias_act(x, params["fc2_w"], params["fc2_b"], relu=False, bias_axis=1)
    return x                                            # (N, 1)


def _out_spatial(size, k, s, p):
    return (size + 2 * p - k) // s + 1


def init_params(key, D, H, W):
    ks = jax.random.split(key, 10)

    def rnd(k, shape, fan_in):
        return jax.random.normal(k, shape, jnp.float32) / jnp.sqrt(fan_in)

    # conv weights: (Cout, Cin, kD, kH, kW), like PyTorch
    w1 = rnd(ks[0], (16, 1, 3, 5, 5), 1 * 3 * 5 * 5)
    b1 = rnd(ks[1], (16,), 1 * 3 * 5 * 5)
    w2 = rnd(ks[2], (32, 16, 1, 3, 3), 16 * 1 * 3 * 3)
    b2 = rnd(ks[3], (32,), 16 * 1 * 3 * 3)
    w3 = rnd(ks[4], (64, 32, 1, 3, 3), 32 * 1 * 3 * 3)
    b3 = rnd(ks[5], (64,), 32 * 1 * 3 * 3)

    # flatten size for the chosen (small) input resolution
    d1, h1, w1s = _out_spatial(D, 3, 1, 0), _out_spatial(H, 5, 2, 2), _out_spatial(W, 5, 2, 2)
    d2, h2, w2s = d1, _out_spatial(h1, 3, 2, 1), _out_spatial(w1s, 3, 2, 1)
    d3, h3, w3s = d2, _out_spatial(h2, 3, 2, 1), _out_spatial(w2s, 3, 2, 1)
    flatten_size = 64 * d3 * h3 * w3s

    # FC weights stored pre-transposed as (in, out) so no .T inside the jit.
    fc1_w = rnd(ks[6], (flatten_size, 512), flatten_size)
    fc1_b = rnd(ks[7], (512,), flatten_size)
    fc2_w = rnd(ks[8], (512, 1), 512)
    fc2_b = rnd(ks[9], (1,), 512)

    return dict(w1=w1, b1=b1, w2=w2, b2=b2, w3=w3, b3=b3,
                fc1_w=fc1_w, fc1_b=fc1_b, fc2_w=fc2_w, fc2_b=fc2_b)


if __name__ == "__main__":
    key = jax.random.PRNGKey(0)
    kx, kp = jax.random.split(key)

    # Small shapes consistent with the module: N=2, C=1, D=5, H=16, W=32
    # (the original dummy was (1, 1, 5, 180, 320); flatten_size is derived
    #  from the actual input resolution here).
    N, C, D, H, W = 2, 1, 5, 16, 32
    x = jax.random.normal(kx, (N, C, D, H, W), jnp.float32)

    params = init_params(kp, D, H, W)

    fwd = jax.jit(network_forward)
    out = fwd(x, params)
    jax.block_until_ready(out)
    assert out.shape == (N, 1), out.shape
    print("KERNEL_OK")
</pallas_src>

<mosaic_0001>
module attributes {stable_mosaic.version = 11 : i64} {
  func.func @_gemm_bias_kernel(%arg0: i32, %arg1: i32, %arg2: i32, %arg3: memref<16x128xf32, #tpu.memory_space<vmem>>, %arg4: memref<128x256xf32, #tpu.memory_space<vmem>>, %arg5: memref<16x1xf32, #tpu.memory_space<vmem>>, %arg6: memref<16x256xf32, #tpu.memory_space<vmem>>, %arg7: memref<16x256xf32, #tpu.memory_space<vmem>>) attributes {dimension_semantics = [#tpu.dimension_semantics<parallel>, #tpu.dimension_semantics<parallel>, #tpu.dimension_semantics<arbitrary>], iteration_bounds = array<i64: 1, 3, 1>, scalar_prefetch = 0 : i64, scratch_operands = 1 : i64, tpu.core_type = #tpu.core_type<tc>, window_params = [{transform_indices = @transform_0, window_bounds = array<i64: 16, 128>}, {transform_indices = @transform_1, window_bounds = array<i64: 128, 256>}, {transform_indices = @transform_2, window_bounds = array<i64: 16, 1>}, {transform_indices = @transform_3, window_bounds = array<i64: 16, 256>}]} {
    %c0_i32 = arith.constant 0 : i32
    %0 = arith.cmpi eq, %arg2, %c0_i32 : i32
    %1 = arith.extui %0 : i1 to i32
    %c0_i32_0 = arith.constant 0 : i32
    %2 = arith.cmpi ne, %1, %c0_i32_0 : i32
    scf.if %2 {
      %cst_10 = arith.constant 0.000000e+00 : f32
      %12 = vector.broadcast %cst_10 : f32 to vector<16x256xf32>
      %c0_11 = arith.constant 0 : index
      %c0_12 = arith.constant 0 : index
      %13 = vector.load %arg7[%c0_11, %c0_12] : memref<16x256xf32, #tpu.memory_space<vmem>>, vector<16x256xf32>
      tpu.vector_store %arg7[%c0_11, %c0_12], %12 {strides = array<i32>} : memref<16x256xf32, #tpu.memory_space<vmem>>, vector<16x256xf32>,
    } else {
    }
    %c0 = arith.constant 0 : index
    %c0_1 = arith.constant 0 : index
    %3 = vector.load %arg7[%c0, %c0_1] : memref<16x256xf32, #tpu.memory_space<vmem>>, vector<16x256xf32>
    %c0_2 = arith.constant 0 : index
    %c0_3 = arith.constant 0 : index
    %4 = vector.load %arg3[%c0_2, %c0_3] : memref<16x128xf32, #tpu.memory_space<vmem>>, vector<16x128xf32>
    %c0_4 = arith.constant 0 : index
    %c0_5 = arith.constant 0 : index
    %5 = vector.load %arg4[%c0_4, %c0_5] : memref<128x256xf32, #tpu.memory_space<vmem>>, vector<128x256xf32>
    %cst = arith.constant dense<0.000000e+00> : vector<16x256xf32>
    %6 = tpu.matmul %4, %5, %cst {dimension_numbers = #tpu.dot_dimension_numbers<[1], [0], [0], [1], [0, 0, 1, 1], [], []>} : vector<16x128xf32>, vector<128x256xf32>, vector<16x256xf32> -> vector<16x256xf32>
    %7 = arith.addf %3, %6 : vector<16x256xf32>
    %c0_6 = arith.constant 0 : index
    %c0_7 = arith.constant 0 : index
    %8 = vector.load %arg7[%c0_6, %c0_7] : memref<16x256xf32, #tpu.memory_space<vmem>>, vector<16x256xf32>
    tpu.vector_store %arg7[%c0_6, %c0_7], %7 {strides = array<i32>} : memref<16x256xf32, #tpu.memory_space<vmem>>, vector<16x256xf32>,
    %c0_i32_8 = arith.constant 0 : i32
    %9 = arith.cmpi eq, %arg2, %c0_i32_8 : i32
    %10 = arith.extui %9 : i1 to i32
    %c0_i32_9 = arith.constant 0 : i32
    %11 = arith.cmpi ne, %10, %c0_i32_9 : i32
    scf.if %11 {
      %c0_10 = arith.constant 0 : index
      %c0_11 = arith.constant 0 : index
      %12 = vector.load %arg7[%c0_10, %c0_11] : memref<16x256xf32, #tpu.memory_space<vmem>>, vector<16x256xf32>
      %c0_12 = arith.constant 0 : index
      %c0_13 = arith.constant 0 : index
      %13 = vector.load %arg5[%c0_12, %c0_13] : memref<16x1xf32, #tpu.memory_space<vmem>>, vector<16x1xf32>
      %14 = vector.broadcast %13 : vector<16x1xf32> to vector<16x256xf32>
      %15 = arith.addf %12, %14 : vector<16x256xf32>
      %cst_14 = arith.constant 0.000000e+00 : f32
      %16 = vector.broadcast %cst_14 : f32 to vector<16x256xf32>
      %17 = arith.maximumf %15, %16 : vector<16x256xf32>
      %c0_15 = arith.constant 0 : index
      %c0_16 = arith.constant 0 : index
      %18 = vector.load %arg6[%c0_15, %c0_16] : memref<16x256xf32, #tpu.memory_space<vmem>>, vector<16x256xf32>
      tpu.vector_store %arg6[%c0_15, %c0_16], %17 {strides = array<i32>} : memref<16x256xf32, #tpu.memory_space<vmem>>, vector<16x256xf32>,
    } else {
    }
    return
  }
  func.func @transform_0(%arg0: i32, %arg1: i32, %arg2: i32) -> (i32, i32) {
    %c0_i32 = arith.constant 0 : i32
    return %arg0, %arg2 : i32, i32
  }
  func.func @transform_1(%arg0: i32, %arg1: i32, %arg2: i32) -> (i32, i32) {
    %c0_i32 = arith.constant 0 : i32
    return %arg2, %arg1 : i32, i32
  }
  func.func @transform_2(%arg0: i32, %arg1: i32, %arg2: i32) -> (i32, i32) {
    %c0_i32 = arith.constant 0 : i32
    %c0_i32_0 = arith.constant 0 : i32
    return %arg0, %c0_i32 : i32, i32
  }
  func.func @transform_3(%arg0: i32, %arg1: i32, %arg2: i32) -> (i32, i32) {
    %c0_i32 = arith.constant 0 : i32
    return %arg0, %arg1 : i32, i32
  }
}

module attributes {stable_mosaic.version = 11 : i64} {
  func.func @_gemm_bias_kernel(%arg0: i32, %arg1: i32, %arg2: i32, %arg3: memref<32x256xf32, #tpu.memory_space<vmem>>, %arg4: memref<256x256xf32, #tpu.memory_space<vmem>>, %arg5: memref<32x1xf32, #tpu.memory_space<vmem>>, %arg6: memref<32x256xf32, #tpu.memory_space<vmem>>, %arg7: memref<32x256xf32, #tpu.memory_space<vmem>>) attributes {dimension_semantics = [#tpu.dimension_semantics<parallel>, #tpu.dimension_semantics<parallel>, #tpu.dimension_semantics<arbitrary>], iteration_bounds = array<i64: 1, 1, 1>, scalar_prefetch = 0 : i64, scratch_operands = 1 : i64, tpu.core_type = #tpu.core_type<tc>, window_params = [{transform_indices = @transform_0, window_bounds = array<i64: 32, 256>}, {transform_indices = @transform_1, window_bounds = array<i64: 256, 256>}, {transform_indices = @transform_2, window_bounds = array<i64: 32, 1>}, {transform_indices = @transform_3, window_bounds = array<i64: 32, 256>}]} {
    %c0_i32 = arith.constant 0 : i32
    %0 = arith.cmpi eq, %arg2, %c0_i32 : i32
    %1 = arith.extui %0 : i1 to i32
    %c0_i32_0 = arith.constant 0 : i32
    %2 = arith.cmpi ne, %1, %c0_i32_0 : i32
    scf.if %2 {
      %cst_10 = arith.constant 0.000000e+00 : f32
      %12 = vector.broadcast %cst_10 : f32 to vector<32x256xf32>
      %c0_11 = arith.constant 0 : index
      %c0_12 = arith.constant 0 : index
      %13 = vector.load %arg7[%c0_11, %c0_12] : memref<32x256xf32, #tpu.memory_space<vmem>>, vector<32x256xf32>
      tpu.vector_store %arg7[%c0_11, %c0_12], %12 {strides = array<i32>} : memref<32x256xf32, #tpu.memory_space<vmem>>, vector<32x256xf32>,
    } else {
    }
    %c0 = arith.constant 0 : index
    %c0_1 = arith.constant 0 : index
    %3 = vector.load %arg7[%c0, %c0_1] : memref<32x256xf32, #tpu.memory_space<vmem>>, vector<32x256xf32>
    %c0_2 = arith.constant 0 : index
    %c0_3 = arith.constant 0 : index
    %4 = vector.load %arg3[%c0_2, %c0_3] : memref<32x256xf32, #tpu.memory_space<vmem>>, vector<32x256xf32>
    %c0_4 = arith.constant 0 : index
    %c0_5 = arith.constant 0 : index
    %5 = vector.load %arg4[%c0_4, %c0_5] : memref<256x256xf32, #tpu.memory_space<vmem>>, vector<256x256xf32>
    %cst = arith.constant dense<0.000000e+00> : vector<32x256xf32>
    %6 = tpu.matmul %4, %5, %cst {dimension_numbers = #tpu.dot_dimension_numbers<[1], [0], [0], [1], [0, 0, 1, 1], [], []>} : vector<32x256xf32>, vector<256x256xf32>, vector<32x256xf32> -> vector<32x256xf32>
    %7 = arith.addf %3, %6 : vector<32x256xf32>
    %c0_6 = arith.constant 0 : index
    %c0_7 = arith.constant 0 : index
    %8 = vector.load %arg7[%c0_6, %c0_7] : memref<32x256xf32, #tpu.memory_space<vmem>>, vector<32x256xf32>
    tpu.vector_store %arg7[%c0_6, %c0_7], %7 {strides = array<i32>} : memref<32x256xf32, #tpu.memory_space<vmem>>, vector<32x256xf32>,
    %c0_i32_8 = arith.constant 0 : i32
    %9 = arith.cmpi eq, %arg2, %c0_i32_8 : i32
    %10 = arith.extui %9 : i1 to i32
    %c0_i32_9 = arith.constant 0 : i32
    %11 = arith.cmpi ne, %10, %c0_i32_9 : i32
    scf.if %11 {
      %c0_10 = arith.constant 0 : index
      %c0_11 = arith.constant 0 : index
      %12 = vector.load %arg7[%c0_10, %c0_11] : memref<32x256xf32, #tpu.memory_space<vmem>>, vector<32x256xf32>
      %c0_12 = arith.constant 0 : index
      %c0_13 = arith.constant 0 : index
      %13 = vector.load %arg5[%c0_12, %c0_13] : memref<32x1xf32, #tpu.memory_space<vmem>>, vector<32x1xf32>
      %14 = vector.broadcast %13 : vector<32x1xf32> to vector<32x256xf32>
      %15 = arith.addf %12, %14 : vector<32x256xf32>
      %cst_14 = arith.constant 0.000000e+00 : f32
      %16 = vector.broadcast %cst_14 : f32 to vector<32x256xf32>
      %17 = arith.maximumf %15, %16 : vector<32x256xf32>
      %c0_15 = arith.constant 0 : index
      %c0_16 = arith.constant 0 : index
      %18 = vector.load %arg6[%c0_15, %c0_16] : memref<32x256xf32, #tpu.memory_space<vmem>>, vector<32x256xf32>
      tpu.vector_store %arg6[%c0_15, %c0_16], %17 {strides = array<i32>} : memref<32x256xf32, #tpu.memory_space<vmem>>, vector<32x256xf32>,
    } else {
    }
    return
  }
  func.func @transform_0(%arg0: i32, %arg1: i32, %arg2: i32) -> (i32, i32) {
    %c0_i32 = arith.constant 0 : i32
    return %arg0, %arg2 : i32, i32
  }
  func.func @transform_1(%arg0: i32, %arg1: i32, %arg2: i32) -> (i32, i32) {
    %c0_i32 = arith.constant 0 : i32
    return %arg2, %arg1 : i32, i32
  }
  func.func @transform_2(%arg0: i32, %arg1: i32, %arg2: i32) -> (i32, i32) {
    %c0_i32 = arith.constant 0 : i32
    %c0_i32_0 = arith.constant 0 : i32
    return %arg0, %c0_i32 : i32, i32
  }
  func.func @transform_3(%arg0: i32, %arg1: i32, %arg2: i32) -> (i32, i32) {
    %c0_i32 = arith.constant 0 : i32
    return %arg0, %arg1 : i32, i32
  }
}

module attributes {stable_mosaic.version = 11 : i64} {
  func.func @_gemm_bias_kernel(%arg0: i32, %arg1: i32, %arg2: i32, %arg3: memref<64x384xf32, #tpu.memory_space<vmem>>, %arg4: memref<384x128xf32, #tpu.memory_space<vmem>>, %arg5: memref<64x1xf32, #tpu.memory_space<vmem>>, %arg6: memref<64x128xf32, #tpu.memory_space<vmem>>, %arg7: memref<64x128xf32, #tpu.memory_space<vmem>>) attributes {dimension_semantics = [#tpu.dimension_semantics<parallel>, #tpu.dimension_semantics<parallel>, #tpu.dimension_semantics<arbitrary>], iteration_bounds = array<i64: 1, 1, 1>, scalar_prefetch = 0 : i64, scratch_operands = 1 : i64, tpu.core_type = #tpu.core_type<tc>, window_params = [{transform_indices = @transform_0, window_bounds = array<i64: 64, 384>}, {transform_indices = @transform_1, window_bounds = array<i64: 384, 128>}, {transform_indices = @transform_2, window_bounds = array<i64: 64, 1>}, {transform_indices = @transform_3, window_bounds = array<i64: 64, 128>}]} {
    %c0_i32 = arith.constant 0 : i32
    %0 = arith.cmpi eq, %arg2, %c0_i32 : i32
    %1 = arith.extui %0 : i1 to i32
    %c0_i32_0 = arith.constant 0 : i32
    %2 = arith.cmpi ne, %1, %c0_i32_0 : i32
    scf.if %2 {
      %cst_10 = arith.constant 0.000000e+00 : f32
      %12 = vector.broadcast %cst_10 : f32 to vector<64x128xf32>
      %c0_11 = arith.constant 0 : index
      %c0_12 = arith.constant 0 : index
      %13 = vector.load %arg7[%c0_11, %c0_12] : memref<64x128xf32, #tpu.memory_space<vmem>>, vector<64x128xf32>
      tpu.vector_store %arg7[%c0_11, %c0_12], %12 {strides = array<i32>} : memref<64x128xf32, #tpu.memory_space<vmem>>, vector<64x128xf32>,
    } else {
    }
    %c0 = arith.constant 0 : index
    %c0_1 = arith.constant 0 : index
    %3 = vector.load %arg7[%c0, %c0_1] : memref<64x128xf32, #tpu.memory_space<vmem>>, vector<64x128xf32>
    %c0_2 = arith.constant 0 : index
    %c0_3 = arith.constant 0 : index
    %4 = vector.load %arg3[%c0_2, %c0_3] : memref<64x384xf32, #tpu.memory_space<vmem>>, vector<64x384xf32>
    %c0_4 = arith.constant 0 : index
    %c0_5 = arith.constant 0 : index
    %5 = vector.load %arg4[%c0_4, %c0_5] : memref<384x128xf32, #tpu.memory_space<vmem>>, vector<384x128xf32>
    %cst = arith.constant dense<0.000000e+00> : vector<64x128xf32>
    %6 = tpu.matmul %4, %5, %cst {dimension_numbers = #tpu.dot_dimension_numbers<[1], [0], [0], [1], [0, 0, 1, 1], [], []>} : vector<64x384xf32>, vector<384x128xf32>, vector<64x128xf32> -> vector<64x128xf32>
    %7 = arith.addf %3, %6 : vector<64x128xf32>
    %c0_6 = arith.constant 0 : index
    %c0_7 = arith.constant 0 : index
    %8 = vector.load %arg7[%c0_6, %c0_7] : memref<64x128xf32, #tpu.memory_space<vmem>>, vector<64x128xf32>
    tpu.vector_store %arg7[%c0_6, %c0_7], %7 {strides = array<i32>} : memref<64x128xf32, #tpu.memory_space<vmem>>, vector<64x128xf32>,
    %c0_i32_8 = arith.constant 0 : i32
    %9 = arith.cmpi eq, %arg2, %c0_i32_8 : i32
    %10 = arith.extui %9 : i1 to i32
    %c0_i32_9 = arith.constant 0 : i32
    %11 = arith.cmpi ne, %10, %c0_i32_9 : i32
    scf.if %11 {
      %c0_10 = arith.constant 0 : index
      %c0_11 = arith.constant 0 : index
      %12 = vector.load %arg7[%c0_10, %c0_11] : memref<64x128xf32, #tpu.memory_space<vmem>>, vector<64x128xf32>
      %c0_12 = arith.constant 0 : index
      %c0_13 = arith.constant 0 : index
      %13 = vector.load %arg5[%c0_12, %c0_13] : memref<64x1xf32, #tpu.memory_space<vmem>>, vector<64x1xf32>
      %14 = vector.broadcast %13 : vector<64x1xf32> to vector<64x128xf32>
      %15 = arith.addf %12, %14 : vector<64x128xf32>
      %cst_14 = arith.constant 0.000000e+00 : f32
      %16 = vector.broadcast %cst_14 : f32 to vector<64x128xf32>
      %17 = arith.maximumf %15, %16 : vector<64x128xf32>
      %c0_15 = arith.constant 0 : index
      %c0_16 = arith.constant 0 : index
      %18 = vector.load %arg6[%c0_15, %c0_16] : memref<64x128xf32, #tpu.memory_space<vmem>>, vector<64x128xf32>
      tpu.vector_store %arg6[%c0_15, %c0_16], %17 {strides = array<i32>} : memref<64x128xf32, #tpu.memory_space<vmem>>, vector<64x128xf32>,
    } else {
    }
    return
  }
  func.func @transform_0(%arg0: i32, %arg1: i32, %arg2: i32) -> (i32, i32) {
    %c0_i32 = arith.constant 0 : i32
    return %arg0, %arg2 : i32, i32
  }
  func.func @transform_1(%arg0: i32, %arg1: i32, %arg2: i32) -> (i32, i32) {
    %c0_i32 = arith.constant 0 : i32
    return %arg2, %arg1 : i32, i32
  }
  func.func @transform_2(%arg0: i32, %arg1: i32, %arg2: i32) -> (i32, i32) {
    %c0_i32 = arith.constant 0 : i32
    %c0_i32_0 = arith.constant 0 : i32
    return %arg0, %c0_i32 : i32, i32
  }
  func.func @transform_3(%arg0: i32, %arg1: i32, %arg2: i32) -> (i32, i32) {
    %c0_i32 = arith.constant 0 : i32
    return %arg0, %arg1 : i32, i32
  }
}

module attributes {stable_mosaic.version = 11 : i64} {
  func.func @_gemm_bias_kernel(%arg0: i32, %arg1: i32, %arg2: i32, %arg3: memref<8x512xf32, #tpu.memory_space<vmem>>, %arg4: memref<512x256xf32, #tpu.memory_space<vmem>>, %arg5: memref<1x256xf32, #tpu.memory_space<vmem>>, %arg6: memref<8x256xf32, #tpu.memory_space<vmem>>, %arg7: memref<8x256xf32, #tpu.memory_space<vmem>>) attributes {dimension_semantics = [#tpu.dimension_semantics<parallel>, #tpu.dimension_semantics<parallel>, #tpu.dimension_semantics<arbitrary>], iteration_bounds = array<i64: 1, 2, 3>, scalar_prefetch = 0 : i64, scratch_operands = 1 : i64, tpu.core_type = #tpu.core_type<tc>, window_params = [{transform_indices = @transform_0, window_bounds = array<i64: 8, 512>}, {transform_indices = @transform_1, window_bounds = array<i64: 512, 256>}, {transform_indices = @transform_2, window_bounds = array<i64: 1, 256>}, {transform_indices = @transform_3, window_bounds = array<i64: 8, 256>}]} {
    %c0_i32 = arith.constant 0 : i32
    %0 = arith.cmpi eq, %arg2, %c0_i32 : i32
    %1 = arith.extui %0 : i1 to i32
    %c0_i32_0 = arith.constant 0 : i32
    %2 = arith.cmpi ne, %1, %c0_i32_0 : i32
    scf.if %2 {
      %cst_9 = arith.constant 0.000000e+00 : f32
      %12 = vector.broadcast %cst_9 : f32 to vector<8x256xf32>
      %c0_10 = arith.constant 0 : index
      %c0_11 = arith.constant 0 : index
      %13 = vector.load %arg7[%c0_10, %c0_11] : memref<8x256xf32, #tpu.memory_space<vmem>>, vector<8x256xf32>
      tpu.vector_store %arg7[%c0_10, %c0_11], %12 {strides = array<i32>} : memref<8x256xf32, #tpu.memory_space<vmem>>, vector<8x256xf32>,
    } else {
    }
    %c0 = arith.constant 0 : index
    %c0_1 = arith.constant 0 : index
    %3 = vector.load %arg7[%c0, %c0_1] : memref<8x256xf32, #tpu.memory_space<vmem>>, vector<8x256xf32>
    %c0_2 = arith.constant 0 : index
    %c0_3 = arith.constant 0 : index
    %4 = vector.load %arg3[%c0_2, %c0_3] : memref<8x512xf32, #tpu.memory_space<vmem>>, vector<8x512xf32>
    %c0_4 = arith.constant 0 : index
    %c0_5 = arith.constant 0 : index
    %5 = vector.load %arg4[%c0_4, %c0_5] : memref<512x256xf32, #tpu.memory_space<vmem>>, vector<512x256xf32>
    %cst = arith.constant dense<0.000000e+00> : vector<8x256xf32>
    %6 = tpu.matmul %4, %5, %cst {dimension_numbers = #tpu.dot_dimension_numbers<[1], [0], [0], [1], [0, 0, 1, 1], [], []>} : vector<8x512xf32>, vector<512x256xf32>, vector<8x256xf32> -> vector<8x256xf32>
    %7 = arith.addf %3, %6 : vector<8x256xf32>
    %c0_6 = arith.constant 0 : index
    %c0_7 = arith.constant 0 : index
    %8 = vector.load %arg7[%c0_6, %c0_7] : memref<8x256xf32, #tpu.memory_space<vmem>>, vector<8x256xf32>
    tpu.vector_store %arg7[%c0_6, %c0_7], %7 {strides = array<i32>} : memref<8x256xf32, #tpu.memory_space<vmem>>, vector<8x256xf32>,
    %c2_i32 = arith.constant 2 : i32
    %9 = arith.cmpi eq, %arg2, %c2_i32 : i32
    %10 = arith.extui %9 : i1 to i32
    %c0_i32_8 = arith.constant 0 : i32
    %11 = arith.cmpi ne, %10, %c0_i32_8 : i32
    scf.if %11 {
      %c0_9 = arith.constant 0 : index
      %c0_10 = arith.constant 0 : index
      %12 = vector.load %arg7[%c0_9, %c0_10] : memref<8x256xf32, #tpu.memory_space<vmem>>, vector<8x256xf32>
      %c0_11 = arith.constant 0 : index
      %c0_12 = arith.constant 0 : index
      %13 = vector.load %arg5[%c0_11, %c0_12] : memref<1x256xf32, #tpu.memory_space<vmem>>, vector<1x256xf32>
      %14 = vector.broadcast %13 : vector<1x256xf32> to vector<8x256xf32>
      %15 = arith.addf %12, %14 : vector<8x256xf32>
      %cst_13 = arith.constant 0.000000e+00 : f32
      %16 = vector.broadcast %cst_13 : f32 to vector<8x256xf32>
      %17 = arith.maximumf %15, %16 : vector<8x256xf32>
      %c0_14 = arith.constant 0 : index
      %c0_15 = arith.constant 0 : index
      %18 = vector.load %arg6[%c0_14, %c0_15] : memref<8x256xf32, #tpu.memory_space<vmem>>, vector<8x256xf32>
      tpu.vector_store %arg6[%c0_14, %c0_15], %17 {strides = array<i32>} : memref<8x256xf32, #tpu.memory_space<vmem>>, vector<8x256xf32>,
    } else {
    }
    return
  }
  func.func @transform_0(%arg0: i32, %arg1: i32, %arg2: i32) -> (i32, i32) {
    %c0_i32 = arith.constant 0 : i32
    return %arg0, %arg2 : i32, i32
  }
  func.func @transform_1(%arg0: i32, %arg1: i32, %arg2: i32) -> (i32, i32) {
    %c0_i32 = arith.constant 0 : i32
    return %arg2, %arg1 : i32, i32
  }
  func.func @transform_2(%arg0: i32, %arg1: i32, %arg2: i32) -> (i32, i32) {
    %c0_i32 = arith.constant 0 : i32
    %c0_i32_0 = arith.constant 0 : i32
    return %c0_i32, %arg1 : i32, i32
  }
  func.func @transform_3(%arg0: i32, %arg1: i32, %arg2: i32) -> (i32, i32) {
    %c0_i32 = arith.constant 0 : i32
    return %arg0, %arg1 : i32, i32
  }
}

module attributes {stable_mosaic.version = 11 : i64} {
  func.func @_gemm_bias_kernel(%arg0: i32, %arg1: i32, %arg2: i32, %arg3: memref<8x512xf32, #tpu.memory_space<vmem>>, %arg4: memref<512x128xf32, #tpu.memory_space<vmem>>, %arg5: memref<1x128xf32, #tpu.memory_space<vmem>>, %arg6: memref<8x128xf32, #tpu.memory_space<vmem>>, %arg7: memref<8x128xf32, #tpu.memory_space<vmem>>) attributes {dimension_semantics = [#tpu.dimension_semantics<parallel>, #tpu.dimension_semantics<parallel>, #tpu.dimension_semantics<arbitrary>], iteration_bounds = array<i64: 1, 1, 1>, scalar_prefetch = 0 : i64, scratch_operands = 1 : i64, tpu.core_type = #tpu.core_type<tc>, window_params = [{transform_indices = @transform_0, window_bounds = array<i64: 8, 512>}, {transform_indices = @transform_1, window_bounds = array<i64: 512, 128>}, {transform_indices = @transform_2, window_bounds = array<i64: 1, 128>}, {transform_indices = @transform_3, window_bounds = array<i64: 8, 128>}]} {
    %c0_i32 = arith.constant 0 : i32
    %0 = arith.cmpi eq, %arg2, %c0_i32 : i32
    %1 = arith.extui %0 : i1 to i32
    %c0_i32_0 = arith.constant 0 : i32
    %2 = arith.cmpi ne, %1, %c0_i32_0 : i32
    scf.if %2 {
      %cst_10 = arith.constant 0.000000e+00 : f32
      %12 = vector.broadcast %cst_10 : f32 to vector<8x128xf32>
      %c0_11 = arith.constant 0 : index
      %c0_12 = arith.constant 0 : index
      %13 = vector.load %arg7[%c0_11, %c0_12] : memref<8x128xf32, #tpu.memory_space<vmem>>, vector<8x128xf32>
      tpu.vector_store %arg7[%c0_11, %c0_12], %12 {strides = array<i32>} : memref<8x128xf32, #tpu.memory_space<vmem>>, vector<8x128xf32>,
    } else {
    }
    %c0 = arith.constant 0 : index
    %c0_1 = arith.constant 0 : index
    %3 = vector.load %arg7[%c0, %c0_1] : memref<8x128xf32, #tpu.memory_space<vmem>>, vector<8x128xf32>
    %c0_2 = arith.constant 0 : index
    %c0_3 = arith.constant 0 : index
    %4 = vector.load %arg3[%c0_2, %c0_3] : memref<8x512xf32, #tpu.memory_space<vmem>>, vector<8x512xf32>
    %c0_4 = arith.constant 0 : index
    %c0_5 = arith.constant 0 : index
    %5 = vector.load %arg4[%c0_4, %c0_5] : memref<512x128xf32, #tpu.memory_space<vmem>>, vector<512x128xf32>
    %cst = arith.constant dense<0.000000e+00> : vector<8x128xf32>
    %6 = tpu.matmul %4, %5, %cst {dimension_numbers = #tpu.dot_dimension_numbers<[1], [0], [0], [1], [0, 0, 1, 1], [], []>} : vector<8x512xf32>, vector<512x128xf32>, vector<8x128xf32> -> vector<8x128xf32>
    %7 = arith.addf %3, %6 : vector<8x128xf32>
    %c0_6 = arith.constant 0 : index
    %c0_7 = arith.constant 0 : index
    %8 = vector.load %arg7[%c0_6, %c0_7] : memref<8x128xf32, #tpu.memory_space<vmem>>, vector<8x128xf32>
    tpu.vector_store %arg7[%c0_6, %c0_7], %7 {strides = array<i32>} : memref<8x128xf32, #tpu.memory_space<vmem>>, vector<8x128xf32>,
    %c0_i32_8 = arith.constant 0 : i32
    %9 = arith.cmpi eq, %arg2, %c0_i32_8 : i32
    %10 = arith.extui %9 : i1 to i32
    %c0_i32_9 = arith.constant 0 : i32
    %11 = arith.cmpi ne, %10, %c0_i32_9 : i32
    scf.if %11 {
      %c0_10 = arith.constant 0 : index
      %c0_11 = arith.constant 0 : index
      %12 = vector.load %arg7[%c0_10, %c0_11] : memref<8x128xf32, #tpu.memory_space<vmem>>, vector<8x128xf32>
      %c0_12 = arith.constant 0 : index
      %c0_13 = arith.constant 0 : index
      %13 = vector.load %arg5[%c0_12, %c0_13] : memref<1x128xf32, #tpu.memory_space<vmem>>, vector<1x128xf32>
      %14 = vector.broadcast %13 : vector<1x128xf32> to vector<8x128xf32>
      %15 = arith.addf %12, %14 : vector<8x128xf32>
      %c0_14 = arith.constant 0 : index
      %c0_15 = arith.constant 0 : index
      %16 = vector.load %arg6[%c0_14, %c0_15] : memref<8x128xf32, #tpu.memory_space<vmem>>, vector<8x128xf32>
      tpu.vector_store %arg6[%c0_14, %c0_15], %15 {strides = array<i32>} : memref<8x128xf32, #tpu.memory_space<vmem>>, vector<8x128xf32>,
    } else {
    }
    return
  }
  func.func @transform_0(%arg0: i32, %arg1: i32, %arg2: i32) -> (i32, i32) {
    %c0_i32 = arith.constant 0 : i32
    return %arg0, %arg2 : i32, i32
  }
  func.func @transform_1(%arg0: i32, %arg1: i32, %arg2: i32) -> (i32, i32) {
    %c0_i32 = arith.constant 0 : i32
    return %arg2, %arg1 : i32, i32
  }
  func.func @transform_2(%arg0: i32, %arg1: i32, %arg2: i32) -> (i32, i32) {
    %c0_i32 = arith.constant 0 : i32
    %c0_i32_0 = arith.constant 0 : i32
    return %c0_i32, %arg1 : i32, i32
  }
  func.func @transform_3(%arg0: i32, %arg1: i32, %arg2: i32) -> (i32, i32) {
    %c0_i32 = arith.constant 0 : i32
    return %arg0, %arg1 : i32, i32
  }
}

</mosaic_0001>

<bundles_post_ra>
// kernel: network_forward.5
= control target key start
LH: loop header
LB: loop body
LE: loop exit
PB: predicated region body
PF: predicated region fallthrough
CT: control target
= control target key end

     0   :  { %s809_s12 = smov 0   ;;  %s811_s13 = smov 0   ;;  %s999_s0 = inlined_call_operand.vmem [shape: f32[16,128], index: 0, kind: input, shape index: {}]   ;;  %s1000_s1 = inlined_call_operand.vmem [shape: f32[128,768], index: 1, kind: input, shape index: {}]   ;;  %s1001_s2 = inlined_call_operand.vmem [shape: f32[16,1], index: 2, kind: input, shape index: {}]   ;;  %s1002_s3 = inlined_call_operand.vmem [shape: f32[16,768], index: 3, kind: output, shape index: {}]  }
   0x1   :  { %s813_s14 = smov 0   ;;  %s815_s15 = smov 0  }
   0x2   :  { %s817_s16 = smov 0  }
   0x3 LB: > { %s28_s17 = sadd.s32 1, %s781_s15  ;;  %s637_s18 = sadd.s32 4294967295, %s785_s16   ;;  %s785_s16 = sphi %s817_s16, %s13_s16   ;;  %s781_s15 = sphi %s815_s15, %s1007_s15   ;;  %s777_s14 = sphi %s813_s14, %s1006_s14   ;;  %s773_s13 = sphi %s811_s13, %s1005_s13   ;;  %s769_s12 = sphi %s809_s12, %s1004_s12  }
   0x4   : > { %p30_p0 = scmp.ge.s32.totalorder %s28_s17, 3  ;;  %p76_p1 = scmp.ne.s32.totalorder %s773_s13, %s769_s12 }
   0x5   : > { %p77_p2 = scmp.eq.s32.totalorder %s785_s16, 0  ;;  %p134_p4 = scmp.eq.s32.totalorder %s637_s18, 2 }
   0x6   : > { %s1009_s17 = smov (%p30_p0, %s28_s17), 0  ;;  %s69_s20 = sadd.s32 1, %s773_s13 }
   0x7   : > { %p78_p3 = por %p77_p2, %p76_p1  ;;  %s65_s19 = ssub.s32 %s781_s15, %s1009_s17 }
   0x8   : > { %p67_p5 = scmp.eq.s32.totalorder %s65_s19, 0  ;;  %p844_p6 = por %p134_p4, %p76_p1 }
   0x9   : > { %p642_p7 = scmp.ge.s32.totalorder %s785_s16, 3 }
   0xa   : > { %s849_s22 = scalar_select %p67_p5, %s773_s13, %s69_s20  }
   0xb   : > { %177 = sbr.rel (%p642_p7) target bundleno = 38 (0x26), region = 24 }
  0x12   : > { %180 = sbr.rel (!%p78_p3) target bundleno = 38 (0x26), region = 28  ;;  %s182_s23 = sand.u32 (%p78_p3), 1, %s773_s13  }
  0x13   : > { %s654_s24 = sshll.u32 (%p78_p3), %s781_s15, 4  ;;  %s643_s25 = sshll.u32 (%p78_p3), %s182_s23, 8 }
  0x14   : > { %s857_s28 = scalar_lea.vmem (%p78_p3), %s1000_s1, %s654_s24  ;;  %s862_s29 = scalar_lea.vmem (%p78_p3), [#allocation3], %s643_s25 }
  0x15   : > { %v203_v0 = vld [vmem:[%s857_s28] sm:$0xff] (%p78_p3)  ;;  %v205_v1 = vld [vmem:[%s857_s28 + $0x8] sm:$0xff] (%p78_p3)  ;;  %v207_v2 = vld [vmem:[%s857_s28 + $0x30] sm:$0xff] (%p78_p3) }
  0x16   : > { %204 = vst [vmem:[%s862_s29] sm:$0xff] (%p78_p3), %v203_v0  ;;  %206 = vst [vmem:[%s862_s29 + $0x8] sm:$0xff] (%p78_p3), %v205_v1  ;;  %v209_v3 = vld [vmem:[%s857_s28 + $0x38] sm:$0xff] (%p78_p3)  ;;  %v211_v4 = vld [vmem:[%s857_s28 + $0x60] sm:$0xff] (%p78_p3) }
  0x17   : > { %208 = vst [vmem:[%s862_s29 + $0x10] sm:$0xff] (%p78_p3), %v207_v2  ;;  %v213_v5 = vld [vmem:[%s857_s28 + $0x68] sm:$0xff] (%p78_p3)  ;;  %210 = vst [vmem:[%s862_s29 + $0x18] sm:$0xff] (%p78_p3), %v209_v3  ;;  %v215_v6 = vld [vmem:[%s857_s28 + $0x90] sm:$0xff] (%p78_p3) }
  0x18   : > { %212 = vst [vmem:[%s862_s29 + $0x20] sm:$0xff] (%p78_p3), %v211_v4  ;;  %214 = vst [vmem:[%s862_s29 + $0x28] sm:$0xff] (%p78_p3), %v213_v5  ;;  %v217_v7 = vld [vmem:[%s857_s28 + $0x98] sm:$0xff] (%p78_p3)  ;;  %v219_v8 = vld [vmem:[%s857_s28 + $0xc0] sm:$0xff] (%p78_p3) }
  0x19   : > { %216 = vst [vmem:[%s862_s29 + $0x30] sm:$0xff] %v215_v6  ;;  %218 = vst [vmem:[%s862_s29 + $0x38] sm:$0xff] %v217_v7  ;;  %v221_v9 = vld [vmem:[%s857_s28 + $0xc8] sm:$0xff]  ;;  %v223_v10 = vld [vmem:[%s857_s28 + $0xf0] sm:$0xff] }
  0x1a   : > { %220 = vst [vmem:[%s862_s29 + $0x40] sm:$0xff] %v219_v8  ;;  %v225_v11 = vld [vmem:[%s857_s28 + $0xf8] sm:$0xff]  ;;  %222 = vst [vmem:[%s862_s29 + $0x48] sm:$0xff] %v221_v9  ;;  %v227_v12 = vld [vmem:[%s857_s28 + $0x120] sm:$0xff] }
  0x1b   : > { %224 = vst [vmem:[%s862_s29 + $0x50] sm:$0xff] %v223_v10  ;;  %226 = vst [vmem:[%s862_s29 + $0x58] sm:$0xff] %v225_v11  ;;  %v229_v13 = vld [vmem:[%s857_s28 + $0x128] sm:$0xff]  ;;  %v231_v14 = vld [vmem:[%s857_s28 + $0x150] sm:$0xff] }
  0x1c   : > { %228 = vst [vmem:[%s862_s29 + $0x60] sm:$0xff] %v227_v12  ;;  %230 = vst [vmem:[%s862_s29 + $0x68] sm:$0xff] %v229_v13  ;;  %v233_v15 = vld [vmem:[%s857_s28 + $0x158] sm:$0xff]  ;;  %v235_v16 = vld [vmem:[%s857_s28 + $0x180] sm:$0xff] }
  0x1d   : > { %232 = vst [vmem:[%s862_s29 + $0x70] sm:$0xff] %v231_v14  ;;  %v237_v17 = vld [vmem:[%s857_s28 + $0x188] sm:$0xff]  ;;  %234 = vst [vmem:[%s862_s29 + $0x78] sm:$0xff] %v233_v15  ;;  %v239_v18 = vld [vmem:[%s857_s28 + $0x1b0] sm:$0xff] }
  0x1e   : > { %236 = vst [vmem:[%s862_s29 + $0x80] sm:$0xff] %v235_v16  ;;  %238 = vst [vmem:[%s862_s29 + $0x88] sm:$0xff] %v237_v17  ;;  %v241_v19 = vld [vmem:[%s857_s28 + $0x1b8] sm:$0xff]  ;;  %v243_v20 = vld [vmem:[%s857_s28 + $0x1e0] sm:$0xff] }
  0x1f   : > { %240 = vst [vmem:[%s862_s29 + $0x90] sm:$0xff] %v239_v18  ;;  %242 = vst [vmem:[%s862_s29 + $0x98] sm:$0xff] %v241_v19  ;;  %v245_v21 = vld [vmem:[%s857_s28 + $0x1e8] sm:$0xff]  ;;  %v247_v22 = vld [vmem:[%s857_s28 + $0x210] sm:$0xff] }
  0x20   : > { %244 = vst [vmem:[%s862_s29 + $0xa0] sm:$0xff] %v243_v20  ;;  %v249_v23 = vld [vmem:[%s857_s28 + $0x218] sm:$0xff]  ;;  %246 = vst [vmem:[%s862_s29 + $0xa8] sm:$0xff] %v245_v21  ;;  %v251_v24 = vld [vmem:[%s857_s28 + $0x240] sm:$0xff] }
  0x21   : > { %248 = vst [vmem:[%s862_s29 + $0xb0] sm:$0xff] %v247_v22  ;;  %250 = vst [vmem:[%s862_s29 + $0xb8] sm:$0xff] %v249_v23  ;;  %v253_v25 = vld [vmem:[%s857_s28 + $0x248] sm:$0xff]  ;;  %v255_v26 = vld [vmem:[%s857_s28 + $0x270] sm:$0xff] }
  0x22   : > { %252 = vst [vmem:[%s862_s29 + $0xc0] sm:$0xff] %v251_v24  ;;  %254 = vst [vmem:[%s862_s29 + $0xc8] sm:$0xff] %v253_v25  ;;  %v257_v27 = vld [vmem:[%s857_s28 + $0x278] sm:$0xff]  ;;  %v259_v28 = vld [vmem:[%s857_s28 + $0x2a0] sm:$0xff] }
  0x23   : > { %256 = vst [vmem:[%s862_s29 + $0xd0] sm:$0xff] %v255_v26  ;;  %v261_v29 = vld [vmem:[%s857_s28 + $0x2a8] sm:$0xff]  ;;  %258 = vst [vmem:[%s862_s29 + $0xd8] sm:$0xff] %v257_v27  ;;  %v263_v30 = vld [vmem:[%s857_s28 + $0x2d0] sm:$0xff] }
  0x24   : > { %260 = vst [vmem:[%s862_s29 + $0xe0] sm:$0xff] %v259_v28  ;;  %262 = vst [vmem:[%s862_s29 + $0xe8] sm:$0xff] %v261_v29  ;;  %v265_v31 = vld [vmem:[%s857_s28 + $0x2d8] sm:$0xff] }
  0x25   : > { %264 = vst [vmem:[%s862_s29 + $0xf0] sm:$0xff] %v263_v30  ;;  %266 = vst [vmem:[%s862_s29 + $0xf8] sm:$0xff] %v265_v31 }
  0x26 PF: > { %p646_p8 = scmp.ge.s32.totalorder %s785_s16, 1  ;;  %p271_p9 = scmp.lt.s32.totalorder %s785_s16, 4 }
  0x28   : > { %p272_p10 = pnand %p646_p8, %p271_p9 }
  0x29   : > { %s278_s30 = sand.u32 (!%p272_p10), 1, %s769_s12   ;;  %v470_v32 = vld [vmem:[%s1001_s2] sm:$0xff] (!%p272_p10)  ;;  %v787_v33 = vmov (!%p272_p10), 0.0   ;;  %v788_v34 = vmov (!%p272_p10), 0   ;;  %v471_v48 = vld [vmem:[%s1001_s2 + $0x8] sm:$0xff] (!%p272_p10) }
  0x2a   : > { %275 = sbr.rel (%p272_p10) target bundleno = 305 (0x131), region = 51  ;;  %s647_s6 = sshll.u32 (!%p272_p10), %s278_s30, 8  ;;  %442 = vmatprep.mubr.f32.mxu0 (!%p272_p10), %v787_v33  ;;  %448 = vmatprep.mubr.f32.mxu1 (!%p272_p10), %v787_v33  ;;  %v344_v20 = vld [vmem:[%s999_s0] sm:$0xff] (!%p272_p10)  ;;  %v345_v21 = vld [vmem:[%s999_s0 + $0x8] sm:$0xff] (!%p272_p10) }
  0x2b   : > { %746 = vset.pattern.permute.xlu0 (!%p272_p10), %v788_v34  ;;  %s933_s7 = scalar_lea.vmem (!%p272_p10), [#allocation3], %s647_s6  ;;  %s648_s20 = sshll.u32 (!%p272_p10), %s278_s30, 5 }
  0x2c   : > { %v347_v35 = vld [vmem:[%s933_s7 + $0x8] sm:$0xff] (!%p272_p10)  ;;  %v349_v36 = vld [vmem:[%s933_s7 + $0x18] sm:$0xff] (!%p272_p10)  ;;  %v346_v37 = vld [vmem:[%s933_s7] sm:$0xff] (!%p272_p10)  ;;  %474 = vperm.xlu0 (!%p272_p10), %746, %v470_v32   ;;  %s312_s23 = scalar_lea.vmem (!%p272_p10), [#allocation4], %s648_s20 }
  0x2d   : > { %v656_v38 = vpack.c.bf16 (!%p272_p10), %v349_v36, %v347_v35  ;;  %v348_v39 = vld [vmem:[%s933_s7 + $0x10] sm:$0xff] (!%p272_p10)  ;;  %v351_v40 = vld [vmem:[%s933_s7 + $0x28] sm:$0xff] (!%p272_p10)  ;;  %v353_v41 = vld [vmem:[%s933_s7 + $0x38] sm:$0xff] (!%p272_p10) }
  0x2e   : > { %v658_v42 = vpack.c.bf16 (!%p272_p10), %v348_v39, %v346_v37  ;;  %v660_v43 = vpack.c.bf16 (!%p272_p10), %v353_v41, %v351_v40  ;;  %v350_v44 = vld [vmem:[%s933_s7 + $0x20] sm:$0xff] (!%p272_p10)  ;;  %v352_v45 = vld [vmem:[%s933_s7 + $0x30] sm:$0xff] (!%p272_p10)  ;;  %v355_v46 = vld [vmem:[%s933_s7 + $0x48] sm:$0xff] (!%p272_p10) }
  0x2f   : > { %657 = vmatprep.subr.bf16.mxu0 (!%p272_p10), %v656_v38  ;;  %688 = vmatprep.subr.bf16.mxu1 (!%p272_p10), %v656_v38  ;;  %v357_v47 = vld [vmem:[%s933_s7 + $0x58] sm:$0xff] (!%p272_p10)  ;;  %v662_v49 = vpack.c.bf16 (!%p272_p10), %v352_v45, %v350_v44  ;;  %v354_v51 = vld [vmem:[%s933_s7 + $0x40] sm:$0xff] (!%p272_p10)  ;;  %v356_v52 = vld [vmem:[%s933_s7 + $0x50] sm:$0xff] (!%p272_p10) }
  0x30   : > { %659 = vmatpush1.bf16.msra.mxu0 (!%p272_p10), %v658_v42  ;;  %696 = vmatpush1.bf16.msra.mxu1 (!%p272_p10), %v658_v42  ;;  %v664_v50 = vpack.c.bf16 (!%p272_p10), %v357_v47, %v355_v46  ;;  %v359_v53 = vld [vmem:[%s933_s7 + $0x68] sm:$0xff] (!%p272_p10)  ;;  %v361_v54 = vld [vmem:[%s933_s7 + $0x78] sm:$0xff] (!%p272_p10)  ;;  %v666_v55 = vpack.c.bf16 (!%p272_p10), %v356_v52, %v354_v51  ;;  %v358_v57 = vld [vmem:[%s933_s7 + $0x60] sm:$0xff] (!%p272_p10) }
  0x31   : > { %661 = vmatprep.subr.bf16.mxu0 %v660_v43  ;;  %689 = vmatprep.subr.bf16.mxu1 %v660_v43  ;;  %v668_v56 = vpack.c.bf16 %v361_v54, %v359_v53  ;;  %v360_v58 = vld [vmem:[%s933_s7 + $0x70] sm:$0xff]  ;;  %v363_v59 = vld [vmem:[%s933_s7 + $0x88] sm:$0xff]  ;;  %v365_v60 = vld [vmem:[%s933_s7 + $0x98] sm:$0xff]  ;;  %s655_s12 = sshll.u32 (%p844_p6), %s777_s14, 4 }
  0x32   : > { %479 = vperm.xlu0 %746, %v471_v48   ;;  %v670_v61 = vpack.c.bf16 %v360_v58, %v358_v57  ;;  %v672_v62 = vpack.c.bf16 %v365_v60, %v363_v59  ;;  %v362_v63 = vld [vmem:[%s933_s7 + $0x80] sm:$0xff]  ;;  %v364_v0 = vld [vmem:[%s933_s7 + $0x90] sm:$0xff]  ;;  %v367_v1 = vld [vmem:[%s933_s7 + $0xa8] sm:$0xff]  ;;  %s506_s26 = scalar_lea.vmem (%p844_p6), %s1002_s3, %s655_s12 }
  0x33   : > { %v369_v2 = vld [vmem:[%s933_s7 + $0xb8] sm:$0xff]  ;;  %v674_v3 = vpack.c.bf16 %v364_v0, %v362_v63  ;;  %v366_v5 = vld [vmem:[%s933_s7 + $0xa0] sm:$0xff]  ;;  %v368_v6 = vld [vmem:[%s933_s7 + $0xb0] sm:$0xff] }
  0x34   : > { %663 = vmatpush1.bf16.msra.mxu0 %v662_v49  ;;  %697 = vmatpush1.bf16.msra.mxu1 %v662_v49  ;;  %v676_v4 = vpack.c.bf16 %v369_v2, %v367_v1  ;;  %v371_v7 = vld [vmem:[%s933_s7 + $0xc8] sm:$0xff]  ;;  %v373_v8 = vld [vmem:[%s933_s7 + $0xd8] sm:$0xff]  ;;  %v678_v9 = vpack.c.bf16 %v368_v6, %v366_v5  ;;  %v370_v11 = vld [vmem:[%s933_s7 + $0xc0] sm:$0xff] }
  0x35   : > { %665 = vmatprep.subr.bf16.mxu0 %v664_v50  ;;  %690 = vmatprep.subr.bf16.mxu1 %v664_v50  ;;  %v680_v10 = vpack.c.bf16 %v373_v8, %v371_v7  ;;  %v372_v12 = vld [vmem:[%s933_s7 + $0xd0] sm:$0xff]  ;;  %v375_v13 = vld [vmem:[%s933_s7 + $0xe8] sm:$0xff]  ;;  %v377_v14 = vld [vmem:[%s933_s7 + $0xf8] sm:$0xff] }
  0x36   : > { %v682_v15 = vpack.c.bf16 %v372_v12, %v370_v11  ;;  %v684_v16 = vpack.c.bf16 %v377_v14, %v375_v13  ;;  %v374_v17 = vld [vmem:[%s933_s7 + $0xe0] sm:$0xff]  ;;  %v376_v18 = vld [vmem:[%s933_s7 + $0xf0] sm:$0xff] }
  0x37   : > { %v686_v19 = vpack.c.bf16 %v376_v18, %v374_v17 }
  0x38   : > { %667 = vmatpush1.bf16.msra.mxu0 %v666_v55  ;;  %698 = vmatpush1.bf16.msra.mxu1 %v666_v55 }
  0x39   : > { %669 = vmatprep.subr.bf16.mxu0 %v668_v56  ;;  %691 = vmatprep.subr.bf16.mxu1 %v668_v56 }
  0x3c   : > { %671 = vmatpush1.bf16.msra.mxu0 %v670_v61  ;;  %699 = vmatpush1.bf16.msra.mxu1 %v670_v61 }
  0x3d   : > { %673 = vmatprep.subr.bf16.mxu0 %v672_v62  ;;  %692 = vmatprep.subr.bf16.mxu1 %v672_v62 }
  0x40   : > { %675 = vmatpush1.bf16.msra.mxu0 %v674_v3  ;;  %700 = vmatpush1.bf16.msra.mxu1 %v674_v3 }
  0x41   : > { %677 = vmatprep.subr.bf16.mxu0 %v676_v4  ;;  %693 = vmatprep.subr.bf16.mxu1 %v676_v4 }
  0x44   : > { %679 = vmatpush1.bf16.msra.mxu0 %v678_v9  ;;  %701 = vmatpush1.bf16.msra.mxu1 %v678_v9 }
  0x45   : > { %681 = vmatprep.subr.bf16.mxu0 %v680_v10  ;;  %694 = vmatprep.subr.bf16.mxu1 %v680_v10 }
  0x48   : > { %683 = vmatpush1.bf16.msra.mxu0 %v682_v15  ;;  %702 = vmatpush1.bf16.msra.mxu1 %v682_v15 }
  0x49   : > { %685 = vmatprep.subr.bf16.mxu0 %v684_v16  ;;  %695 = vmatprep.subr.bf16.mxu1 %v684_v16 }
  0x4c   : > { %687 = vmatpush1.bf16.msra.mxu0 %v686_v19  ;;  %703 = vmatpush1.bf16.msra.mxu1 %v686_v19 }
  0x4f   : > { %443 = vmatmul.mubr.f32.vlgmr.msra.gmra.mrb[0].mxu0 %v344_v20  ;;  %449 = vmatmul.mubr.f32.vlgmr.msra.gmra.mrb[0].mxu1 %v345_v21 }
  0xab   : > { %v475_v22 = vpop.permute.xlu0 %474 }
  0xb1   : > { %v480_v23 = vpop.permute.xlu0 %479 }
 0x122   : > { %v444_v24 = vpop.f32.mrb[0].mxu0  ;;  %v450_v25 = vpop.f32.mrb[0].mxu1  ;;  %500 = sbr.rel (!%p844_p6) target bundleno = 305 (0x131), region = 67 }
 0x123   : > { %v482_v26 = vadd.f32 %v475_v22, %v444_v24  ;;  %v484_v27 = vadd.f32 %v480_v23, %v450_v25  ;;  %v446_v28 = vpop.f32.mrb[1].mxu0  ;;  %v452_v29 = vpop.f32.mrb[1].mxu1 }
 0x124   : > { %v483_v30 = vadd.f32 %v475_v22, %v446_v28  ;;  %v485_v31 = vadd.f32 %v480_v23, %v452_v29 }
 0x125   : > { %v486_v32 = vmax.f32 %v482_v26, 0.0  ;;  %v488_v33 = vmax.f32 %v484_v27, 0.0 }
 0x126   : > { %v487_v34 = vmax.f32 %v483_v30, 0.0  ;;  %v489_v35 = vmax.f32 %v485_v31, 0.0 }
 0x127   : > { %490 = vst [vmem:[%s312_s23] sm:$0xff] %v486_v32  ;;  %492 = vst [vmem:[%s312_s23 + $0x10] sm:$0xff] %v488_v33 }
 0x128   : > { %491 = vst [vmem:[%s312_s23 + $0x8] sm:$0xff] %v487_v34  ;;  %493 = vst [vmem:[%s312_s23 + $0x18] sm:$0xff] %v489_v35 }
 0x12e   : > { %v519_v36 = vld [vmem:[%s312_s23] sm:$0xff]  ;;  %v523_v38 = vld [vmem:[%s312_s23 + $0x10] sm:$0xff] }
 0x12f   : > { %v521_v37 = vld [vmem:[%s312_s23 + $0x8] sm:$0xff]  ;;  %v525_v39 = vld [vmem:[%s312_s23 + $0x18] sm:$0xff]  ;;  %520 = vst [vmem:[%s506_s26] sm:$0xff] %v519_v36  ;;  %524 = vst [vmem:[%s506_s26 + $0x30] sm:$0xff] %v523_v38 }
 0x130   : > { %522 = vst [vmem:[%s506_s26 + $0x8] sm:$0xff] %v521_v37  ;;  %526 = vst [vmem:[%s506_s26 + $0x38] sm:$0xff] %v525_v39 }
 0x131 PF: > { %s13_s16 = sadd.s32 1, %s785_s16   ;;  %s1004_s12 = smov %s773_s13 }
 0x132   : > { %p10_p11 = scmp.ge.s32.totalorder %s13_s16, 5   ;;  %s1005_s13 = smov %s849_s22 }
 0x133   : > { %s1006_s14 = smov %s781_s15  ;;  %s1007_s15 = smov %s1009_s17 }
 0x134   :  { %12 = sbr.rel (!%p10_p11) target bundleno = 3 (0x3), region = 127 }

// kernel: network_forward.6
= control target key start
LH: loop header
LB: loop body
LE: loop exit
PB: predicated region body
PF: predicated region fallthrough
CT: control target
= control target key end

     0   :  { %v373_v3 = vmov 0   ;;  %s646_s1 = inlined_call_operand.vmem [shape: f32[256,256], index: 1, kind: input, shape index: {}]   ;;  %s647_s0 = inlined_call_operand.vmem [shape: f32[32,256], index: 0, kind: input, shape index: {}]   ;;  %s648_s2 = inlined_call_operand.vmem [shape: f32[32,1], index: 2, kind: input, shape index: {}]   ;;  %s649_s3 = inlined_call_operand.vmem [shape: f32[32,256], index: 3, kind: output, shape index: {}]  }
   0x1   :  { %v43_v0 = vld [vmem:[%s646_s1 + $0x8] sm:$0xff]  ;;  %v45_v1 = vld [vmem:[%s646_s1 + $0x18] sm:$0xff]  ;;  %v42_v2 = vld [vmem:[%s646_s1] sm:$0xff]  ;;  %372 = vset.pattern.permute.xlu1 %v373_v3  ;;  %371 = vset.pattern.permute.xlu0 %v373_v3 }
   0x2   :  { %v274_v4 = vpack.c.bf16 %v45_v1, %v43_v0  ;;  %v44_v5 = vld [vmem:[%s646_s1 + $0x10] sm:$0xff]  ;;  %v47_v6 = vld [vmem:[%s646_s1 + $0x28] sm:$0xff]  ;;  %v49_v7 = vld [vmem:[%s646_s1 + $0x38] sm:$0xff] }
   0x3   :  { %v276_v8 = vpack.c.bf16 %v44_v5, %v42_v2  ;;  %v278_v9 = vpack.c.bf16 %v49_v7, %v47_v6  ;;  %v46_v10 = vld [vmem:[%s646_s1 + $0x20] sm:$0xff]  ;;  %v48_v11 = vld [vmem:[%s646_s1 + $0x30] sm:$0xff]  ;;  %v51_v12 = vld [vmem:[%s646_s1 + $0x48] sm:$0xff] }
   0x4   :  { %275 = vmatprep.subr.bf16.mxu0 %v274_v4  ;;  %338 = vmatprep.subr.bf16.mxu1 %v274_v4  ;;  %v53_v13 = vld [vmem:[%s646_s1 + $0x58] sm:$0xff]  ;;  %v280_v14 = vpack.c.bf16 %v48_v11, %v46_v10  ;;  %v50_v16 = vld [vmem:[%s646_s1 + $0x40] sm:$0xff]  ;;  %v52_v17 = vld [vmem:[%s646_s1 + $0x50] sm:$0xff] }
   0x5   :  { %277 = vmatpush1.bf16.msra.mxu0 %v276_v8  ;;  %354 = vmatpush1.bf16.msra.mxu1 %v276_v8  ;;  %v282_v15 = vpack.c.bf16 %v53_v13, %v51_v12  ;;  %v55_v18 = vld [vmem:[%s646_s1 + $0x68] sm:$0xff]  ;;  %v57_v19 = vld [vmem:[%s646_s1 + $0x78] sm:$0xff]  ;;  %v284_v20 = vpack.c.bf16 %v52_v17, %v50_v16  ;;  %v54_v22 = vld [vmem:[%s646_s1 + $0x60] sm:$0xff] }
   0x6   :  { %279 = vmatprep.subr.bf16.mxu0 %v278_v9  ;;  %339 = vmatprep.subr.bf16.mxu1 %v278_v9  ;;  %v286_v21 = vpack.c.bf16 %v57_v19, %v55_v18  ;;  %v56_v23 = vld [vmem:[%s646_s1 + $0x70] sm:$0xff]  ;;  %v59_v24 = vld [vmem:[%s646_s1 + $0x88] sm:$0xff]  ;;  %v61_v25 = vld [vmem:[%s646_s1 + $0x98] sm:$0xff] }
   0x7   :  { %v288_v26 = vpack.c.bf16 %v56_v23, %v54_v22  ;;  %v290_v27 = vpack.c.bf16 %v61_v25, %v59_v24  ;;  %v58_v28 = vld [vmem:[%s646_s1 + $0x80] sm:$0xff]  ;;  %v60_v29 = vld [vmem:[%s646_s1 + $0x90] sm:$0xff]  ;;  %v63_v30 = vld [vmem:[%s646_s1 + $0xa8] sm:$0xff] }
   0x8   :  { %v65_v31 = vld [vmem:[%s646_s1 + $0xb8] sm:$0xff]  ;;  %v292_v32 = vpack.c.bf16 %v60_v29, %v58_v28  ;;  %v62_v34 = vld [vmem:[%s646_s1 + $0xa0] sm:$0xff]  ;;  %v64_v35 = vld [vmem:[%s646_s1 + $0xb0] sm:$0xff] }
   0x9   :  { %281 = vmatpush1.bf16.msra.mxu0 %v280_v14  ;;  %355 = vmatpush1.bf16.msra.mxu1 %v280_v14  ;;  %v294_v33 = vpack.c.bf16 %v65_v31, %v63_v30  ;;  %v67_v36 = vld [vmem:[%s646_s1 + $0xc8] sm:$0xff]  ;;  %v69_v37 = vld [vmem:[%s646_s1 + $0xd8] sm:$0xff]  ;;  %v296_v38 = vpack.c.bf16 %v64_v35, %v62_v34  ;;  %v66_v39 = vld [vmem:[%s646_s1 + $0xc0] sm:$0xff] }
   0xa   :  { %283 = vmatprep.subr.bf16.mxu0 %v282_v15  ;;  %340 = vmatprep.subr.bf16.mxu1 %v282_v15  ;;  %v298_v40 = vpack.c.bf16 %v69_v37, %v67_v36  ;;  %v68_v41 = vld [vmem:[%s646_s1 + $0xd0] sm:$0xff]  ;;  %v35_v42 = vld [vmem:[%s647_s0 + $0x8] sm:$0xff]  ;;  %v73_v45 = vld [vmem:[%s646_s1 + $0xf8] sm:$0xff] }
   0xb   :  { %v39_v43 = vld [vmem:[%s647_s0 + $0x28] sm:$0xff]  ;;  %170 = vmatprep.mubr.f32.mxu0 %v35_v42  ;;  %v300_v46 = vpack.c.bf16 %v68_v41, %v66_v39  ;;  %v224_v47 = vld [vmem:[%s648_s2 + $0x10] sm:$0xff]  ;;  %v222_v48 = vld [vmem:[%s648_s2] sm:$0xff] }
   0xc   :  { %v71_v44 = vld [vmem:[%s646_s1 + $0xe8] sm:$0xff]  ;;  %182 = vmatprep.mubr.f32.mxu1 %v39_v43  ;;  %v70_v50 = vld [vmem:[%s646_s1 + $0xe0] sm:$0xff]  ;;  %v72_v51 = vld [vmem:[%s646_s1 + $0xf0] sm:$0xff]  ;;  %238 = vperm.xlu1 %372, %v224_v47  }
   0xd   :  { %285 = vmatpush1.bf16.msra.mxu0 %v284_v20  ;;  %356 = vmatpush1.bf16.msra.mxu1 %v284_v20  ;;  %v302_v49 = vpack.c.bf16 %v73_v45, %v71_v44  ;;  %v75_v52 = vld [vmem:[%s646_s1 + $0x108] sm:$0xff]  ;;  %v77_v53 = vld [vmem:[%s646_s1 + $0x118] sm:$0xff]  ;;  %v304_v56 = vpack.c.bf16 %v72_v51, %v70_v50  ;;  %v74_v58 = vld [vmem:[%s646_s1 + $0x100] sm:$0xff] }
   0xe   :  { %287 = vmatprep.subr.bf16.mxu0 %v286_v21  ;;  %341 = vmatprep.subr.bf16.mxu1 %v286_v21  ;;  %v225_v54 = vld [vmem:[%s648_s2 + $0x18] sm:$0xff]  ;;  %v223_v55 = vld [vmem:[%s648_s2 + $0x8] sm:$0xff]  ;;  %v306_v57 = vpack.c.bf16 %v77_v53, %v75_v52  ;;  %v76_v59 = vld [vmem:[%s646_s1 + $0x110] sm:$0xff] }
   0xf   :  { %228 = vperm.xlu0 %371, %v222_v48   ;;  %v79_v60 = vld [vmem:[%s646_s1 + $0x128] sm:$0xff]  ;;  %v81_v61 = vld [vmem:[%s646_s1 + $0x138] sm:$0xff]  ;;  %v308_v62 = vpack.c.bf16 %v76_v59, %v74_v58  ;;  %v78_v0 = vld [vmem:[%s646_s1 + $0x120] sm:$0xff] }
  0x10   :  { %243 = vperm.xlu1 %372, %v225_v54   ;;  %v310_v63 = vpack.c.bf16 %v81_v61, %v79_v60  ;;  %v80_v1 = vld [vmem:[%s646_s1 + $0x130] sm:$0xff]  ;;  %v83_v2 = vld [vmem:[%s646_s1 + $0x148] sm:$0xff]  ;;  %v85_v3 = vld [vmem:[%s646_s1 + $0x158] sm:$0xff] }
  0x11   :  { %289 = vmatpush1.bf16.msra.mxu0 %v288_v26  ;;  %357 = vmatpush1.bf16.msra.mxu1 %v288_v26  ;;  %v312_v4 = vpack.c.bf16 %v80_v1, %v78_v0  ;;  %v314_v5 = vpack.c.bf16 %v85_v3, %v83_v2  ;;  %v82_v6 = vld [vmem:[%s646_s1 + $0x140] sm:$0xff]  ;;  %v84_v7 = vld [vmem:[%s646_s1 + $0x150] sm:$0xff]  ;;  %v87_v8 = vld [vmem:[%s646_s1 + $0x168] sm:$0xff] }
  0x12   :  { %291 = vmatprep.subr.bf16.mxu0 %v290_v27  ;;  %342 = vmatprep.subr.bf16.mxu1 %v290_v27  ;;  %v89_v9 = vld [vmem:[%s646_s1 + $0x178] sm:$0xff]  ;;  %v316_v10 = vpack.c.bf16 %v84_v7, %v82_v6  ;;  %v86_v12 = vld [vmem:[%s646_s1 + $0x160] sm:$0xff]  ;;  %v88_v13 = vld [vmem:[%s646_s1 + $0x170] sm:$0xff] }
  0x13   :  { %233 = vperm.xlu0 %371, %v223_v55   ;;  %v318_v11 = vpack.c.bf16 %v89_v9, %v87_v8  ;;  %v91_v14 = vld [vmem:[%s646_s1 + $0x188] sm:$0xff]  ;;  %v93_v15 = vld [vmem:[%s646_s1 + $0x198] sm:$0xff]  ;;  %v320_v16 = vpack.c.bf16 %v88_v13, %v86_v12  ;;  %v90_v18 = vld [vmem:[%s646_s1 + $0x180] sm:$0xff] }
  0x14   :  { %v322_v17 = vpack.c.bf16 %v93_v15, %v91_v14  ;;  %v92_v19 = vld [vmem:[%s646_s1 + $0x190] sm:$0xff]  ;;  %v95_v20 = vld [vmem:[%s646_s1 + $0x1a8] sm:$0xff]  ;;  %v97_v21 = vld [vmem:[%s646_s1 + $0x1b8] sm:$0xff] }
  0x15   :  { %293 = vmatpush1.bf16.msra.mxu0 %v292_v32  ;;  %358 = vmatpush1.bf16.msra.mxu1 %v292_v32  ;;  %v324_v22 = vpack.c.bf16 %v92_v19, %v90_v18  ;;  %v326_v23 = vpack.c.bf16 %v97_v21, %v95_v20  ;;  %v94_v24 = vld [vmem:[%s646_s1 + $0x1a0] sm:$0xff]  ;;  %v96_v25 = vld [vmem:[%s646_s1 + $0x1b0] sm:$0xff]  ;;  %v99_v26 = vld [vmem:[%s646_s1 + $0x1c8] sm:$0xff] }
  0x16   :  { %295 = vmatprep.subr.bf16.mxu0 %v294_v33  ;;  %343 = vmatprep.subr.bf16.mxu1 %v294_v33  ;;  %v101_v27 = vld [vmem:[%s646_s1 + $0x1d8] sm:$0xff]  ;;  %v328_v28 = vpack.c.bf16 %v96_v25, %v94_v24  ;;  %v98_v30 = vld [vmem:[%s646_s1 + $0x1c0] sm:$0xff]  ;;  %v100_v31 = vld [vmem:[%s646_s1 + $0x1d0] sm:$0xff] }
  0x17   :  { %v330_v29 = vpack.c.bf16 %v101_v27, %v99_v26  ;;  %v103_v32 = vld [vmem:[%s646_s1 + $0x1e8] sm:$0xff]  ;;  %v105_v33 = vld [vmem:[%s646_s1 + $0x1f8] sm:$0xff]  ;;  %v332_v34 = vpack.c.bf16 %v100_v31, %v98_v30  ;;  %v102_v36 = vld [vmem:[%s646_s1 + $0x1e0] sm:$0xff] }
  0x18   :  { %v334_v35 = vpack.c.bf16 %v105_v33, %v103_v32  ;;  %v104_v37 = vld [vmem:[%s646_s1 + $0x1f0] sm:$0xff]  ;;  %v34_v39 = vld [vmem:[%s647_s0] sm:$0xff]  ;;  %v37_v41 = vld [vmem:[%s647_s0 + $0x18] sm:$0xff] }
  0x19   :  { %297 = vmatpush1.bf16.msra.mxu0 %v296_v38  ;;  %359 = vmatpush1.bf16.msra.mxu1 %v296_v38  ;;  %v336_v38 = vpack.c.bf16 %v104_v37, %v102_v36  ;;  %v41_v42 = vld [vmem:[%s647_s0 + $0x38] sm:$0xff]  ;;  %v36_v43 = vld [vmem:[%s647_s0 + $0x10] sm:$0xff] }
  0x1a   :  { %299 = vmatprep.subr.bf16.mxu0 %v298_v40  ;;  %344 = vmatprep.subr.bf16.mxu1 %v298_v40  ;;  %v38_v40 = vld [vmem:[%s647_s0 + $0x20] sm:$0xff]  ;;  %v40_v44 = vld [vmem:[%s647_s0 + $0x30] sm:$0xff] }
  0x1d   :  { %301 = vmatpush1.bf16.msra.mxu0 %v300_v46  ;;  %360 = vmatpush1.bf16.msra.mxu1 %v300_v46 }
  0x1e   :  { %303 = vmatprep.subr.bf16.mxu0 %v302_v49  ;;  %345 = vmatprep.subr.bf16.mxu1 %v302_v49 }
  0x21   :  { %305 = vmatpush1.bf16.msra.mxu0 %v304_v56  ;;  %361 = vmatpush1.bf16.msra.mxu1 %v304_v56 }
  0x22   :  { %307 = vmatprep.subr.bf16.mxu0 %v306_v57  ;;  %346 = vmatprep.subr.bf16.mxu1 %v306_v57 }
  0x25   :  { %309 = vmatpush1.bf16.msra.mxu0 %v308_v62  ;;  %362 = vmatpush1.bf16.msra.mxu1 %v308_v62 }
  0x26   :  { %311 = vmatprep.subr.bf16.mxu0 %v310_v63  ;;  %347 = vmatprep.subr.bf16.mxu1 %v310_v63 }
  0x29   :  { %313 = vmatpush1.bf16.msra.mxu0 %v312_v4  ;;  %363 = vmatpush1.bf16.msra.mxu1 %v312_v4 }
  0x2a   :  { %315 = vmatprep.subr.bf16.mxu0 %v314_v5  ;;  %348 = vmatprep.subr.bf16.mxu1 %v314_v5 }
  0x2d   :  { %317 = vmatpush1.bf16.msra.mxu0 %v316_v10  ;;  %364 = vmatpush1.bf16.msra.mxu1 %v316_v10 }
  0x2e   :  { %319 = vmatprep.subr.bf16.mxu0 %v318_v11  ;;  %349 = vmatprep.subr.bf16.mxu1 %v318_v11 }
  0x31   :  { %321 = vmatpush1.bf16.msra.mxu0 %v320_v16  ;;  %365 = vmatpush1.bf16.msra.mxu1 %v320_v16 }
  0x32   :  { %323 = vmatprep.subr.bf16.mxu0 %v322_v17  ;;  %350 = vmatprep.subr.bf16.mxu1 %v322_v17 }
  0x35   :  { %325 = vmatpush1.bf16.msra.mxu0 %v324_v22  ;;  %366 = vmatpush1.bf16.msra.mxu1 %v324_v22 }
  0x36   :  { %327 = vmatprep.subr.bf16.mxu0 %v326_v23  ;;  %351 = vmatprep.subr.bf16.mxu1 %v326_v23 }
  0x39   :  { %329 = vmatpush1.bf16.msra.mxu0 %v328_v28  ;;  %367 = vmatpush1.bf16.msra.mxu1 %v328_v28 }
  0x3a   :  { %331 = vmatprep.subr.bf16.mxu0 %v330_v29  ;;  %352 = vmatprep.subr.bf16.mxu1 %v330_v29 }
  0x3d   :  { %333 = vmatpush1.bf16.msra.mxu0 %v332_v34  ;;  %368 = vmatpush1.bf16.msra.mxu1 %v332_v34 }
  0x3e   :  { %335 = vmatprep.subr.bf16.mxu0 %v334_v35  ;;  %353 = vmatprep.subr.bf16.mxu1 %v334_v35 }
  0x41   :  { %337 = vmatpush1.bf16.msra.mxu0 %v336_v38  ;;  %369 = vmatpush1.bf16.msra.mxu1 %v336_v38 }
  0x44   :  { %171 = vmatmul.mubr.f32.vlgmr.msra.gmra.mrb[0].mxu0 %v34_v39  ;;  %183 = vmatmul.mubr.f32.vlgmr.msra.gmra.mrb[0].mxu1 %v38_v40 }
  0x45   :  { %176 = vmatprep.mubr.f32.mxu0 %v37_v41  ;;  %188 = vmatprep.mubr.f32.mxu1 %v41_v42 }
  0x48   :  { %177 = vmatmul.mubr.f32.gmra.mrb[2].mxu0 %v36_v43  ;;  %189 = vmatmul.mubr.f32.gmra.mrb[2].mxu1 %v40_v44 }
  0x8b   :  { %v239_v45 = vpop.permute.xlu1 %238 }
  0x8e   :  { %v229_v46 = vpop.permute.xlu0 %228 }
  0x8f   :  { %v244_v57 = vpop.permute.xlu1 %243 }
  0x92   :  { %v234_v58 = vpop.permute.xlu0 %233 }
 0x117   :  { %v172_v47 = vpop.f32.mrb[0].mxu0  ;;  %v184_v48 = vpop.f32.mrb[0].mxu1 }
 0x118   :  { %v246_v49 = vadd.f32 %v229_v46, %v172_v47  ;;  %v250_v50 = vadd.f32 %v239_v45, %v184_v48  ;;  %v174_v51 = vpop.f32.mrb[1].mxu0  ;;  %v186_v52 = vpop.f32.mrb[1].mxu1 }
 0x119   :  { %v247_v53 = vadd.f32 %v229_v46, %v174_v51  ;;  %v251_v54 = vadd.f32 %v239_v45, %v186_v52 }
 0x11a   :  { %v254_v55 = vmax.f32 %v246_v49, 0.0  ;;  %v258_v56 = vmax.f32 %v250_v50, 0.0 }
 0x11b   :  { %v255_v59 = vmax.f32 %v247_v53, 0.0  ;;  %v259_v60 = vmax.f32 %v251_v54, 0.0  ;;  %v178_v61 = vpop.f32.mrb[2].mxu0  ;;  %v190_v62 = vpop.f32.mrb[2].mxu1 }
 0x11c   :  { %262 = vst [vmem:[%s649_s3] sm:$0xff] %v254_v55  ;;  %266 = vst [vmem:[%s649_s3 + $0x20] sm:$0xff] %v258_v56  ;;  %v248_v63 = vadd.f32 %v234_v58, %v178_v61  ;;  %v252_v0 = vadd.f32 %v244_v57, %v190_v62  ;;  %v180_v1 = vpop.f32.mrb[3].mxu0  ;;  %v192_v2 = vpop.f32.mrb[3].mxu1 }
 0x11d   :  { %263 = vst [vmem:[%s649_s3 + $0x8] sm:$0xff] %v255_v59  ;;  %267 = vst [vmem:[%s649_s3 + $0x28] sm:$0xff] %v259_v60  ;;  %v249_v3 = vadd.f32 %v234_v58, %v180_v1  ;;  %v253_v4 = vadd.f32 %v244_v57, %v192_v2 }
 0x11e   :  { %v256_v5 = vmax.f32 %v248_v63, 0.0  ;;  %v260_v6 = vmax.f32 %v252_v0, 0.0 }
 0x11f   :  { %v257_v7 = vmax.f32 %v249_v3, 0.0  ;;  %v261_v8 = vmax.f32 %v253_v4, 0.0 }
 0x120   :  { %264 = vst [vmem:[%s649_s3 + $0x10] sm:$0xff] %v256_v5  ;;  %268 = vst [vmem:[%s649_s3 + $0x30] sm:$0xff] %v260_v6 }
 0x121   :  { %265 = vst [vmem:[%s649_s3 + $0x18] sm:$0xff] %v257_v7  ;;  %269 = vst [vmem:[%s649_s3 + $0x38] sm:$0xff] %v261_v8 }

// kernel: network_forward.7
= control target key start
LH: loop header
LB: loop body
LE: loop exit
PB: predicated region body
PF: predicated region fallthrough
CT: control target
= control target key end

     0   :  { %v610_v3 = vmov 0   ;;  %s895_s1 = inlined_call_operand.vmem [shape: f32[384,128], index: 1, kind: input, shape index: {}]   ;;  %s896_s0 = inlined_call_operand.vmem [shape: f32[64,384], index: 0, kind: input, shape index: {}]   ;;  %s897_s2 = inlined_call_operand.vmem [shape: f32[64,1], index: 2, kind: input, shape index: {}]   ;;  %s898_s3 = inlined_call_operand.vmem [shape: f32[64,128], index: 3, kind: output, shape index: {}]  }
   0x1   :  { %v74_v0 = vld [vmem:[%s895_s1 + $0x80] sm:$0xff]  ;;  %v75_v1 = vld [vmem:[%s895_s1 + $0x88] sm:$0xff]  ;;  %608 = vset.pattern.permute.xlu0 %v610_v3  ;;  %609 = vset.pattern.permute.xlu1 %v610_v3  ;;  %v76_v10 = vld [vmem:[%s895_s1 + $0x90] sm:$0xff] }
   0x2   :  { %v58_v2 = vld [vmem:[%s895_s1] sm:$0xff]  ;;  %v543_v4 = vpack.c.bf16 %v75_v1, %v74_v0  ;;  %v59_v5 = vld [vmem:[%s895_s1 + $0x8] sm:$0xff]  ;;  %v77_v11 = vld [vmem:[%s895_s1 + $0x98] sm:$0xff] }
   0x3   :  { %v90_v6 = vld [vmem:[%s895_s1 + $0x100] sm:$0xff]  ;;  %v91_v7 = vld [vmem:[%s895_s1 + $0x108] sm:$0xff]  ;;  %v545_v8 = vpack.c.bf16 %v59_v5, %v58_v2  ;;  %v60_v12 = vld [vmem:[%s895_s1 + $0x10] sm:$0xff]  ;;  %v547_v13 = vpack.c.bf16 %v77_v11, %v76_v10 }
   0x4   :  { %v575_v9 = vpack.c.bf16 %v91_v7, %v90_v6  ;;  %544 = vmatprep.subr.bf16.mxu0 %v543_v4  ;;  %v61_v14 = vld [vmem:[%s895_s1 + $0x18] sm:$0xff]  ;;  %v92_v15 = vld [vmem:[%s895_s1 + $0x110] sm:$0xff]  ;;  %v78_v19 = vld [vmem:[%s895_s1 + $0xa0] sm:$0xff] }
   0x5   :  { %v93_v16 = vld [vmem:[%s895_s1 + $0x118] sm:$0xff]  ;;  %546 = vmatpush3.bf16.msra.mxu0 %v545_v8  ;;  %v549_v17 = vpack.c.bf16 %v61_v14, %v60_v12  ;;  %v79_v20 = vld [vmem:[%s895_s1 + $0xa8] sm:$0xff]  ;;  %v62_v21 = vld [vmem:[%s895_s1 + $0x20] sm:$0xff] }
   0x6   :  { %576 = vmatprep.subr.bf16.mxu1 %v575_v9  ;;  %v579_v18 = vpack.c.bf16 %v93_v16, %v92_v15  ;;  %548 = vmatprep.subr.bf16.mxu0 %v547_v13  ;;  %v551_v22 = vpack.c.bf16 %v79_v20, %v78_v19  ;;  %v63_v23 = vld [vmem:[%s895_s1 + $0x28] sm:$0xff]  ;;  %v94_v24 = vld [vmem:[%s895_s1 + $0x120] sm:$0xff]  ;;  %v80_v27 = vld [vmem:[%s895_s1 + $0xb0] sm:$0xff] }
   0x7   :  { %578 = vmatpush3.bf16.msra.mxu1 %v575_v9  ;;  %v95_v25 = vld [vmem:[%s895_s1 + $0x128] sm:$0xff]  ;;  %v81_v28 = vld [vmem:[%s895_s1 + $0xb8] sm:$0xff]  ;;  %v96_v29 = vld [vmem:[%s895_s1 + $0x130] sm:$0xff]  ;;  %v553_v31 = vpack.c.bf16 %v63_v23, %v62_v21 }
   0x8   :  { %580 = vmatprep.subr.bf16.mxu1 %v579_v18  ;;  %v583_v26 = vpack.c.bf16 %v95_v25, %v94_v24  ;;  %v97_v30 = vld [vmem:[%s895_s1 + $0x138] sm:$0xff]  ;;  %v555_v32 = vpack.c.bf16 %v81_v28, %v80_v27  ;;  %v64_v33 = vld [vmem:[%s895_s1 + $0x30] sm:$0xff]  ;;  %v82_v36 = vld [vmem:[%s895_s1 + $0xc0] sm:$0xff] }
   0x9   :  { %550 = vmatpush3.bf16.msra.mxu0 %v549_v17  ;;  %v65_v34 = vld [vmem:[%s895_s1 + $0x38] sm:$0xff]  ;;  %v587_v35 = vpack.c.bf16 %v97_v30, %v96_v29  ;;  %v83_v37 = vld [vmem:[%s895_s1 + $0xc8] sm:$0xff]  ;;  %v98_v38 = vld [vmem:[%s895_s1 + $0x140] sm:$0xff] }
   0xa   :  { %552 = vmatprep.subr.bf16.mxu0 %v551_v22  ;;  %v99_v39 = vld [vmem:[%s895_s1 + $0x148] sm:$0xff]  ;;  %v557_v40 = vpack.c.bf16 %v65_v34, %v64_v33  ;;  %v559_v41 = vpack.c.bf16 %v83_v37, %v82_v36  ;;  %v66_v42 = vld [vmem:[%s895_s1 + $0x40] sm:$0xff]  ;;  %v84_v45 = vld [vmem:[%s895_s1 + $0xd0] sm:$0xff] }
   0xb   :  { %582 = vmatpush3.bf16.msra.mxu1 %v579_v18  ;;  %v67_v43 = vld [vmem:[%s895_s1 + $0x48] sm:$0xff]  ;;  %v591_v44 = vpack.c.bf16 %v99_v39, %v98_v38  ;;  %v85_v46 = vld [vmem:[%s895_s1 + $0xd8] sm:$0xff]  ;;  %v100_v47 = vld [vmem:[%s895_s1 + $0x150] sm:$0xff] }
   0xc   :  { %584 = vmatprep.subr.bf16.mxu1 %v583_v26  ;;  %v101_v48 = vld [vmem:[%s895_s1 + $0x158] sm:$0xff]  ;;  %v561_v49 = vpack.c.bf16 %v67_v43, %v66_v42  ;;  %v35_v50 = vld [vmem:[%s896_s0 + $0x8] sm:$0xff]  ;;  %v36_v51 = vld [vmem:[%s896_s0 + $0x10] sm:$0xff]  ;;  %v563_v52 = vpack.c.bf16 %v85_v46, %v84_v45 }
   0xd   :  { %554 = vmatpush3.bf16.msra.mxu0 %v553_v31  ;;  %v68_v53 = vld [vmem:[%s895_s1 + $0x50] sm:$0xff]  ;;  %v69_v54 = vld [vmem:[%s895_s1 + $0x58] sm:$0xff]  ;;  %v595_v55 = vpack.c.bf16 %v101_v48, %v100_v47  ;;  %v86_v56 = vld [vmem:[%s895_s1 + $0xe0] sm:$0xff]  ;;  %170 = vmatprep.mubr.f32.mxu0 %v35_v50 }
   0xe   :  { %556 = vmatprep.subr.bf16.mxu0 %v555_v32  ;;  %v87_v57 = vld [vmem:[%s895_s1 + $0xe8] sm:$0xff]  ;;  %v102_v58 = vld [vmem:[%s895_s1 + $0x160] sm:$0xff]  ;;  %531 = vmatprep.mubr.f32.mxu1 %v36_v51  ;;  %v565_v60 = vpack.c.bf16 %v69_v54, %v68_v53  ;;  %v88_v1 = vld [vmem:[%s895_s1 + $0xf0] sm:$0xff] }
   0xf   :  { %586 = vmatpush3.bf16.msra.mxu1 %v583_v26  ;;  %v103_v59 = vld [vmem:[%s895_s1 + $0x168] sm:$0xff]  ;;  %v567_v61 = vpack.c.bf16 %v87_v57, %v86_v56  ;;  %v70_v62 = vld [vmem:[%s895_s1 + $0x60] sm:$0xff]  ;;  %v89_v2 = vld [vmem:[%s895_s1 + $0xf8] sm:$0xff] }
  0x10   :  { %588 = vmatprep.subr.bf16.mxu1 %v587_v35  ;;  %v71_v63 = vld [vmem:[%s895_s1 + $0x68] sm:$0xff]  ;;  %v599_v0 = vpack.c.bf16 %v103_v59, %v102_v58  ;;  %v104_v3 = vld [vmem:[%s895_s1 + $0x170] sm:$0xff]  ;;  %v105_v4 = vld [vmem:[%s895_s1 + $0x178] sm:$0xff]  ;;  %v571_v8 = vpack.c.bf16 %v89_v2, %v88_v1 }
  0x11   :  { %558 = vmatpush3.bf16.msra.mxu0 %v557_v40  ;;  %v569_v5 = vpack.c.bf16 %v71_v63, %v70_v62  ;;  %v343_v6 = vld [vmem:[%s897_s2] sm:$0xff]  ;;  %v345_v7 = vld [vmem:[%s897_s2 + $0x10] sm:$0xff]  ;;  %v73_v10 = vld [vmem:[%s895_s1 + $0x78] sm:$0xff]  ;;  %v603_v11 = vpack.c.bf16 %v105_v4, %v104_v3 }
  0x12   :  { %560 = vmatprep.subr.bf16.mxu0 %v559_v41  ;;  %v72_v9 = vld [vmem:[%s895_s1 + $0x70] sm:$0xff]  ;;  %353 = vperm.xlu0 %608, %v343_v6   ;;  %v344_v12 = vld [vmem:[%s897_s2 + $0x8] sm:$0xff]  ;;  %v346_v14 = vld [vmem:[%s897_s2 + $0x18] sm:$0xff] }
  0x13   :  { %590 = vmatpush3.bf16.msra.mxu1 %v587_v35  ;;  %363 = vperm.xlu1 %609, %v345_v7   ;;  %v573_v13 = vpack.c.bf16 %v73_v10, %v72_v9  ;;  %v347_v15 = vld [vmem:[%s897_s2 + $0x20] sm:$0xff]  ;;  %v348_v17 = vld [vmem:[%s897_s2 + $0x28] sm:$0xff]  ;;  %v349_v21 = vld [vmem:[%s897_s2 + $0x30] sm:$0xff] }
  0x14   :  { %592 = vmatprep.subr.bf16.mxu1 %v591_v44  ;;  %v34_v16 = vld [vmem:[%s896_s0] sm:$0xff]  ;;  %v39_v18 = vld [vmem:[%s896_s0 + $0x28] sm:$0xff]  ;;  %v37_v22 = vld [vmem:[%s896_s0 + $0x18] sm:$0xff] }
  0x15   :  { %562 = vmatpush3.bf16.msra.mxu0 %v561_v49  ;;  %v38_v19 = vld [vmem:[%s896_s0 + $0x20] sm:$0xff]  ;;  %v350_v23 = vld [vmem:[%s897_s2 + $0x38] sm:$0xff]  ;;  %v48_v26 = vld [vmem:[%s896_s0 + $0x70] sm:$0xff] }
  0x16   :  { %564 = vmatprep.subr.bf16.mxu0 %v563_v52  ;;  %358 = vperm.xlu0 %608, %v344_v12   ;;  %v42_v20 = vld [vmem:[%s896_s0 + $0x40] sm:$0xff]  ;;  %v41_v24 = vld [vmem:[%s896_s0 + $0x38] sm:$0xff]  ;;  %v40_v27 = vld [vmem:[%s896_s0 + $0x30] sm:$0xff] }
  0x17   :  { %594 = vmatpush3.bf16.msra.mxu1 %v591_v44  ;;  %368 = vperm.xlu1 %609, %v346_v14   ;;  %v45_v25 = vld [vmem:[%s896_s0 + $0x58] sm:$0xff]  ;;  %v44_v28 = vld [vmem:[%s896_s0 + $0x50] sm:$0xff]  ;;  %v51_v29 = vld [vmem:[%s896_s0 + $0x88] sm:$0xff] }
  0x18   :  { %596 = vmatprep.subr.bf16.mxu1 %v595_v55  ;;  %v54_v30 = vld [vmem:[%s896_s0 + $0xa0] sm:$0xff]  ;;  %v43_v31 = vld [vmem:[%s896_s0 + $0x48] sm:$0xff]  ;;  %v57_v33 = vld [vmem:[%s896_s0 + $0xb8] sm:$0xff] }
  0x19   :  { %566 = vmatpush3.bf16.msra.mxu0 %v565_v60  ;;  %v47_v32 = vld [vmem:[%s896_s0 + $0x68] sm:$0xff]  ;;  %v46_v34 = vld [vmem:[%s896_s0 + $0x60] sm:$0xff]  ;;  %v49_v36 = vld [vmem:[%s896_s0 + $0x78] sm:$0xff] }
  0x1a   :  { %568 = vmatprep.subr.bf16.mxu0 %v567_v61  ;;  %373 = vperm.xlu0 %608, %v347_v15   ;;  %v50_v35 = vld [vmem:[%s896_s0 + $0x80] sm:$0xff]  ;;  %v53_v37 = vld [vmem:[%s896_s0 + $0x98] sm:$0xff]  ;;  %v52_v38 = vld [vmem:[%s896_s0 + $0x90] sm:$0xff] }
  0x1b   :  { %598 = vmatpush3.bf16.msra.mxu1 %v595_v55  ;;  %378 = vperm.xlu1 %609, %v348_v17   ;;  %v56_v39 = vld [vmem:[%s896_s0 + $0xb0] sm:$0xff]  ;;  %v55_v40 = vld [vmem:[%s896_s0 + $0xa8] sm:$0xff] }
  0x1c   :  { %600 = vmatprep.subr.bf16.mxu1 %v599_v0 }
  0x1d   :  { %570 = vmatpush3.bf16.msra.mxu0 %v569_v5 }
  0x1e   :  { %572 = vmatprep.subr.bf16.mxu0 %v571_v8  ;;  %383 = vperm.xlu0 %608, %v349_v21  }
  0x1f   :  { %602 = vmatpush3.bf16.msra.mxu1 %v599_v0  ;;  %388 = vperm.xlu1 %609, %v350_v23  }
  0x20   :  { %604 = vmatprep.subr.bf16.mxu1 %v603_v11 }
  0x21   :  { %574 = vmatpush3.bf16.msra.mxu0 %v573_v13 }
  0x23   :  { %606 = vmatpush3.bf16.msra.mxu1 %v603_v11 }
  0x24   :  { %171 = vmatmul.mubr.f32.vlgmr.msra.gmra.mrb[0].mxu0 %v34_v16 }
  0x25   :  { %175 = vmatprep.mubr.f32.mxu0 %v38_v19 }
  0x26   :  { %532 = vmatmul.mubr.f32.vlgmr.msra.gmra.mrb[0].mxu1 %v39_v18 }
  0x27   :  { %534 = vmatprep.mubr.f32.mxu1 %v42_v20 }
  0x28   :  { %176 = vmatmul.mubr.f32.gmra.mrb[2].mxu0 %v37_v22 }
  0x29   :  { %180 = vmatprep.mubr.f32.mxu0 %v41_v24 }
  0x2a   :  { %535 = vmatmul.mubr.f32.gmra.mrb[2].mxu1 %v45_v25 }
  0x2b   :  { %537 = vmatprep.mubr.f32.mxu1 %v48_v26 }
  0x2c   :  { %181 = vmatmul.mubr.f32.gmra.mrb[4].mxu0 %v40_v27 }
  0x2d   :  { %185 = vmatprep.mubr.f32.mxu0 %v44_v28 }
  0x2e   :  { %538 = vmatmul.mubr.f32.gmra.mrb[4].mxu1 %v51_v29 }
  0x2f   :  { %540 = vmatprep.mubr.f32.mxu1 %v54_v30 }
  0x30   :  { %186 = vmatmul.mubr.f32.gmra.mrb[6].mxu0 %v43_v31 }
  0x31   :  { %190 = vmatprep.mubr.f32.mxu0 %v47_v32 }
  0x32   :  { %541 = vmatmul.mubr.f32.gmra.mrb[6].mxu1 %v57_v33 }
  0x34   :  { %191 = vmatmul.mubr.f32.gmra.mrb[8].mxu0 %v46_v34 }
  0x35   :  { %195 = vmatprep.mubr.f32.mxu0 %v50_v35 }
  0x38   :  { %196 = vmatmul.mubr.f32.gmra.mrb[10].mxu0 %v49_v36 }
  0x39   :  { %200 = vmatprep.mubr.f32.mxu0 %v53_v37 }
  0x3c   :  { %201 = vmatmul.mubr.f32.gmra.mrb[12].mxu0 %v52_v38 }
  0x3d   :  { %205 = vmatprep.mubr.f32.mxu0 %v56_v39 }
  0x40   :  { %206 = vmatmul.mubr.f32.gmra.mrb[14].mxu0 %v55_v40 }
  0x91   :  { %v354_v42 = vpop.permute.xlu0 %353 }
  0x92   :  { %v364_v63 = vpop.permute.xlu1 %363 }
  0x95   :  { %v359_v54 = vpop.permute.xlu0 %358 }
  0x96   :  { %v369_v11 = vpop.permute.xlu1 %368 }
  0x99   :  { %v374_v18 = vpop.permute.xlu0 %373 }
  0x9a   :  { %v379_v25 = vpop.permute.xlu1 %378 }
  0x9d   :  { %v384_v32 = vpop.permute.xlu0 %383 }
  0x9e   :  { %v389_v38 = vpop.permute.xlu1 %388 }
  0xf7   :  { %v451_v41 = vpop.f32.mrb[0].mxu0 }
  0xf8   :  { %v452_v43 = vpop.f32.mrb[1].mxu0 }
  0xf9   :  { %v533_v44 = vpop.f32.mrb[0].mxu1  ;;  %v453_v45 = vadd.f32 %v452_v43, %v451_v41 }
  0xfa   :  { %v277_v46 = vpop.f32.mrb[1].mxu1 }
  0xfb   :  { %v278_v47 = vadd.f32 %v453_v45, %v277_v46  ;;  %v454_v48 = vpop.f32.mrb[2].mxu0 }
  0xfc   :  { %v455_v49 = vpop.f32.mrb[3].mxu0 }
  0xfd   :  { %v536_v50 = vpop.f32.mrb[2].mxu1  ;;  %v391_v51 = vadd.f32 %v354_v42, %v278_v47  ;;  %v456_v52 = vadd.f32 %v455_v49, %v454_v48 }
  0xfe   :  { %v287_v53 = vpop.f32.mrb[3].mxu1 }
  0xff   :  { %v399_v55 = vmax.f32 %v391_v51, 0.0  ;;  %v457_v56 = vpop.f32.mrb[4].mxu0  ;;  %v283_v57 = vadd.f32 %v533_v44, %v456_v52 }
 0x100   :  { %v458_v58 = vpop.f32.mrb[5].mxu0 }
 0x101   :  { %v539_v59 = vpop.f32.mrb[4].mxu1  ;;  %407 = vst [vmem:[%s898_s3] sm:$0xff] %v399_v55  ;;  %v392_v60 = vadd.f32 %v359_v54, %v283_v57  ;;  %v459_v61 = vadd.f32 %v458_v58, %v457_v56 }
 0x102   :  { %v297_v62 = vpop.f32.mrb[5].mxu1 }
 0x103   :  { %v400_v0 = vmax.f32 %v392_v60, 0.0  ;;  %v288_v1 = vadd.f32 %v459_v61, %v287_v53  ;;  %v460_v2 = vpop.f32.mrb[6].mxu0 }
 0x104   :  { %v461_v3 = vpop.f32.mrb[7].mxu0 }
 0x105   :  { %v542_v4 = vpop.f32.mrb[6].mxu1  ;;  %408 = vst [vmem:[%s898_s3 + $0x8] sm:$0xff] %v400_v0  ;;  %v393_v5 = vadd.f32 %v364_v63, %v288_v1  ;;  %v462_v6 = vadd.f32 %v461_v3, %v460_v2 }
 0x106   :  { %v307_v7 = vpop.f32.mrb[7].mxu1 }
 0x107   :  { %v401_v8 = vmax.f32 %v393_v5, 0.0  ;;  %v293_v9 = vadd.f32 %v536_v50, %v462_v6  ;;  %v463_v10 = vpop.f32.mrb[8].mxu0 }
 0x108   :  { %v464_v12 = vpop.f32.mrb[9].mxu0 }
 0x109   :  { %409 = vst [vmem:[%s898_s3 + $0x10] sm:$0xff] %v401_v8  ;;  %v394_v13 = vadd.f32 %v369_v11, %v293_v9  ;;  %v465_v14 = vadd.f32 %v464_v12, %v463_v10 }
 0x10b   :  { %v402_v15 = vmax.f32 %v394_v13, 0.0  ;;  %v298_v16 = vadd.f32 %v465_v14, %v297_v62  ;;  %v466_v17 = vpop.f32.mrb[10].mxu0 }
 0x10c   :  { %v467_v19 = vpop.f32.mrb[11].mxu0 }
 0x10d   :  { %410 = vst [vmem:[%s898_s3 + $0x18] sm:$0xff] %v402_v15  ;;  %v395_v20 = vadd.f32 %v374_v18, %v298_v16  ;;  %v468_v21 = vadd.f32 %v467_v19, %v466_v17 }
 0x10f   :  { %v403_v22 = vmax.f32 %v395_v20, 0.0  ;;  %v303_v23 = vadd.f32 %v539_v59, %v468_v21  ;;  %v469_v24 = vpop.f32.mrb[12].mxu0 }
 0x110   :  { %v470_v26 = vpop.f32.mrb[13].mxu0 }
 0x111   :  { %411 = vst [vmem:[%s898_s3 + $0x20] sm:$0xff] %v403_v22  ;;  %v396_v27 = vadd.f32 %v379_v25, %v303_v23  ;;  %v471_v28 = vadd.f32 %v470_v26, %v469_v24 }
 0x113   :  { %v404_v29 = vmax.f32 %v396_v27, 0.0  ;;  %v308_v30 = vadd.f32 %v471_v28, %v307_v7  ;;  %v472_v31 = vpop.f32.mrb[14].mxu0 }
 0x114   :  { %v473_v33 = vpop.f32.mrb[15].mxu0 }
 0x115   :  { %412 = vst [vmem:[%s898_s3 + $0x28] sm:$0xff] %v404_v29  ;;  %v397_v34 = vadd.f32 %v384_v32, %v308_v30  ;;  %v474_v35 = vadd.f32 %v473_v33, %v472_v31 }
 0x117   :  { %v405_v36 = vmax.f32 %v397_v34, 0.0  ;;  %v313_v37 = vadd.f32 %v542_v4, %v474_v35 }
 0x119   :  { %413 = vst [vmem:[%s898_s3 + $0x30] sm:$0xff] %v405_v36  ;;  %v398_v39 = vadd.f32 %v389_v38, %v313_v37 }
 0x11b   :  { %v406_v40 = vmax.f32 %v398_v39, 0.0 }
 0x11d   :  { %414 = vst [vmem:[%s898_s3 + $0x38] sm:$0xff] %v406_v40 }

// kernel: network_forward.8
= control target key start
LH: loop header
LB: loop body
LE: loop exit
PB: predicated region body
PF: predicated region fallthrough
CT: control target
= control target key end

     0   :  { %s1255_s12 = smov 0   ;;  %s1257_s13 = smov 0   ;;  %s1761_s0 = inlined_call_operand.vmem [shape: f32[8,1536], index: 0, kind: input, shape index: {}]   ;;  %s1762_s1 = inlined_call_operand.vmem [shape: f32[1536,512], index: 1, kind: input, shape index: {}]   ;;  %s1763_s2 = inlined_call_operand.vmem [shape: f32[1,512], index: 2, kind: input, shape index: {}]   ;;  %s1764_s3 = inlined_call_operand.vmem [shape: f32[8,512], index: 3, kind: output, shape index: {}]  }
   0x1   :  { %s1259_s14 = smov 0   ;;  %s1261_s15 = smov 0  }
   0x2   :  { %s1263_s16 = smov 0   ;;  %s1265_s17 = smov 0  }
   0x3   :  { %s1267_s18 = smov 0  }
   0x4 LB: > { %s25_s19 = sadd.s32 1, %s1224_s16  ;;  %s28_s20 = sadd.s32 1, %s1228_s17  ;;  %s1232_s18 = sphi %s1267_s18, %s13_s18   ;;  %s1228_s17 = sphi %s1265_s17, %s1770_s17   ;;  %s1224_s16 = sphi %s1263_s16, %s1769_s16   ;;  %s1220_s15 = sphi %s1261_s15, %s1768_s15   ;;  %s1216_s14 = sphi %s1259_s14, %s1767_s14   ;;  %s1212_s13 = sphi %s1257_s13, %s1766_s13   ;;  %s1208_s12 = sphi %s1255_s12, %s1765_s12  }
   0x5   : > { %p26_p0 = scmp.ge.s32.totalorder %s25_s19, 3  ;;  %p76_p1 = scmp.ne.s32.totalorder %s1212_s13, %s1208_s12 }
   0x6   : > { %p77_p2 = scmp.eq.s32.totalorder %s1232_s18, 0  ;;  %s69_s24 = sadd.s32 1, %s1212_s13 }
   0x7   : > { %s1772_s19 = smov (%p26_p0, %s25_s19), 0  ;;  %s1774_s20 = smov (!%p26_p0, %s28_s20), %s1228_s17 }
   0x8   : > { %p78_p3 = por %p77_p2, %p76_p1  ;;  %p30_p4 = scmp.ge.s32.totalorder %s1774_s20, 2 }
   0x9   : > { %s64_s21 = ssub.s32 %s1224_s16, %s1772_s19  ;;  %p973_p6 = scmp.ge.s32.totalorder %s1232_s18, 6 }
   0xa   : > { %s1776_s20 = smov (%p30_p4, %s1774_s20), 0 }
   0xb   : > { %s65_s22 = ssub.s32 %s1228_s17, %s1776_s20  ;;  %156 = sbr.rel (%p973_p6) target bundleno = 89 (0x59), region = 16 }
   0xc   : > { %s66_s23 = sor.u32 %s65_s22, %s64_s21 }
   0xd   : > { %p67_p5 = scmp.eq.s32.totalorder %s66_s23, 0 }
   0xf   : > { %s1306_s25 = scalar_select %p67_p5, %s1212_s13, %s69_s24  }
  0x12   : > { %172 = sbr.rel (!%p78_p3) target bundleno = 89 (0x59), region = 24  ;;  %s174_s26 = sand.u32 (%p78_p3), 1, %s1212_s13  }
  0x13   : > { %s976_s27 = sshll.u32 (%p78_p3), %s1228_s17, 1  ;;  %s974_s28 = sshll.u32 (%p78_p3), %s174_s26, 10 }
  0x14   : > { %s990_s29 = sshll.u32 (%p78_p3), %s1224_s16, 8  ;;  %s1320_s8 = scalar_lea.vmem (%p78_p3), [#allocation3], %s974_s28 }
  0x15   : > { %s180_s30 = sadd.s32 (%p78_p3), %s990_s29, %s976_s27 }
  0x16   : > { %s978_s4 = sshll.u32 (%p78_p3), %s180_s30, 3 }
  0x17   : > { %s1315_s7 = scalar_lea.vmem (%p78_p3), %s1762_s1, %s978_s4 }
  0x18   : > { %v195_v0 = vld [vmem:[%s1315_s7] sm:$0xff] (%p78_p3)  ;;  %v197_v1 = vld [vmem:[%s1315_s7 + $0x8] sm:$0xff] (%p78_p3) }
  0x19   : > { %v199_v2 = vld [vmem:[%s1315_s7 + $0x20] sm:$0xff]  ;;  %196 = vst [vmem:[%s1320_s8] sm:$0xff] %v195_v0  ;;  %198 = vst [vmem:[%s1320_s8 + $0x8] sm:$0xff] %v197_v1  ;;  %v201_v3 = vld [vmem:[%s1315_s7 + $0x28] sm:$0xff] }
  0x1a   : > { %200 = vst [vmem:[%s1320_s8 + $0x10] sm:$0xff] %v199_v2  ;;  %v203_v4 = vld [vmem:[%s1315_s7 + $0x40] sm:$0xff]  ;;  %v205_v5 = vld [vmem:[%s1315_s7 + $0x48] sm:$0xff]  ;;  %202 = vst [vmem:[%s1320_s8 + $0x18] sm:$0xff] %v201_v3 }
  0x1b   : > { %204 = vst [vmem:[%s1320_s8 + $0x20] sm:$0xff] %v203_v4  ;;  %206 = vst [vmem:[%s1320_s8 + $0x28] sm:$0xff] %v205_v5  ;;  %v207_v6 = vld [vmem:[%s1315_s7 + $0x60] sm:$0xff]  ;;  %v209_v7 = vld [vmem:[%s1315_s7 + $0x68] sm:$0xff] }
  0x1c   : > { %v211_v8 = vld [vmem:[%s1315_s7 + $0x80] sm:$0xff]  ;;  %208 = vst [vmem:[%s1320_s8 + $0x30] sm:$0xff] %v207_v6  ;;  %210 = vst [vmem:[%s1320_s8 + $0x38] sm:$0xff] %v209_v7  ;;  %v213_v9 = vld [vmem:[%s1315_s7 + $0x88] sm:$0xff] }
  0x1d   : > { %212 = vst [vmem:[%s1320_s8 + $0x40] sm:$0xff] %v211_v8  ;;  %v215_v10 = vld [vmem:[%s1315_s7 + $0xa0] sm:$0xff]  ;;  %v217_v11 = vld [vmem:[%s1315_s7 + $0xa8] sm:$0xff]  ;;  %214 = vst [vmem:[%s1320_s8 + $0x48] sm:$0xff] %v213_v9 }
  0x1e   : > { %216 = vst [vmem:[%s1320_s8 + $0x50] sm:$0xff] %v215_v10  ;;  %218 = vst [vmem:[%s1320_s8 + $0x58] sm:$0xff] %v217_v11  ;;  %v219_v12 = vld [vmem:[%s1315_s7 + $0xc0] sm:$0xff]  ;;  %v221_v13 = vld [vmem:[%s1315_s7 + $0xc8] sm:$0xff] }
  0x1f   : > { %v223_v14 = vld [vmem:[%s1315_s7 + $0xe0] sm:$0xff]  ;;  %220 = vst [vmem:[%s1320_s8 + $0x60] sm:$0xff] %v219_v12  ;;  %222 = vst [vmem:[%s1320_s8 + $0x68] sm:$0xff] %v221_v13  ;;  %v225_v15 = vld [vmem:[%s1315_s7 + $0xe8] sm:$0xff] }
  0x20   : > { %224 = vst [vmem:[%s1320_s8 + $0x70] sm:$0xff] %v223_v14  ;;  %v227_v16 = vld [vmem:[%s1315_s7 + $0x100] sm:$0xff]  ;;  %v229_v17 = vld [vmem:[%s1315_s7 + $0x108] sm:$0xff]  ;;  %226 = vst [vmem:[%s1320_s8 + $0x78] sm:$0xff] %v225_v15 }
  0x21   : > { %228 = vst [vmem:[%s1320_s8 + $0x80] sm:$0xff] %v227_v16  ;;  %230 = vst [vmem:[%s1320_s8 + $0x88] sm:$0xff] %v229_v17  ;;  %v231_v18 = vld [vmem:[%s1315_s7 + $0x120] sm:$0xff]  ;;  %v233_v19 = vld [vmem:[%s1315_s7 + $0x128] sm:$0xff] }
  0x22   : > { %v235_v20 = vld [vmem:[%s1315_s7 + $0x140] sm:$0xff]  ;;  %232 = vst [vmem:[%s1320_s8 + $0x90] sm:$0xff] %v231_v18  ;;  %234 = vst [vmem:[%s1320_s8 + $0x98] sm:$0xff] %v233_v19  ;;  %v237_v21 = vld [vmem:[%s1315_s7 + $0x148] sm:$0xff] }
  0x23   : > { %236 = vst [vmem:[%s1320_s8 + $0xa0] sm:$0xff] %v235_v20  ;;  %v239_v22 = vld [vmem:[%s1315_s7 + $0x160] sm:$0xff]  ;;  %v241_v23 = vld [vmem:[%s1315_s7 + $0x168] sm:$0xff]  ;;  %238 = vst [vmem:[%s1320_s8 + $0xa8] sm:$0xff] %v237_v21 }
  0x24   : > { %240 = vst [vmem:[%s1320_s8 + $0xb0] sm:$0xff] %v239_v22  ;;  %242 = vst [vmem:[%s1320_s8 + $0xb8] sm:$0xff] %v241_v23  ;;  %v243_v24 = vld [vmem:[%s1315_s7 + $0x180] sm:$0xff]  ;;  %v245_v25 = vld [vmem:[%s1315_s7 + $0x188] sm:$0xff] }
  0x25   : > { %v247_v26 = vld [vmem:[%s1315_s7 + $0x1a0] sm:$0xff]  ;;  %244 = vst [vmem:[%s1320_s8 + $0xc0] sm:$0xff] %v243_v24  ;;  %246 = vst [vmem:[%s1320_s8 + $0xc8] sm:$0xff] %v245_v25  ;;  %v249_v27 = vld [vmem:[%s1315_s7 + $0x1a8] sm:$0xff] }
  0x26   : > { %248 = vst [vmem:[%s1320_s8 + $0xd0] sm:$0xff] %v247_v26  ;;  %v251_v28 = vld [vmem:[%s1315_s7 + $0x1c0] sm:$0xff]  ;;  %v253_v29 = vld [vmem:[%s1315_s7 + $0x1c8] sm:$0xff]  ;;  %250 = vst [vmem:[%s1320_s8 + $0xd8] sm:$0xff] %v249_v27 }
  0x27   : > { %252 = vst [vmem:[%s1320_s8 + $0xe0] sm:$0xff] %v251_v28  ;;  %254 = vst [vmem:[%s1320_s8 + $0xe8] sm:$0xff] %v253_v29  ;;  %v255_v30 = vld [vmem:[%s1315_s7 + $0x1e0] sm:$0xff]  ;;  %v257_v31 = vld [vmem:[%s1315_s7 + $0x1e8] sm:$0xff] }
  0x28   : > { %v259_v32 = vld [vmem:[%s1315_s7 + $0x200] sm:$0xff]  ;;  %256 = vst [vmem:[%s1320_s8 + $0xf0] sm:$0xff] %v255_v30  ;;  %258 = vst [vmem:[%s1320_s8 + $0xf8] sm:$0xff] %v257_v31  ;;  %v261_v33 = vld [vmem:[%s1315_s7 + $0x208] sm:$0xff] }
  0x29   : > { %260 = vst [vmem:[%s1320_s8 + $0x100] sm:$0xff] %v259_v32  ;;  %v263_v34 = vld [vmem:[%s1315_s7 + $0x220] sm:$0xff]  ;;  %v265_v35 = vld [vmem:[%s1315_s7 + $0x228] sm:$0xff]  ;;  %262 = vst [vmem:[%s1320_s8 + $0x108] sm:$0xff] %v261_v33 }
  0x2a   : > { %264 = vst [vmem:[%s1320_s8 + $0x110] sm:$0xff] %v263_v34  ;;  %266 = vst [vmem:[%s1320_s8 + $0x118] sm:$0xff] %v265_v35  ;;  %v267_v36 = vld [vmem:[%s1315_s7 + $0x240] sm:$0xff]  ;;  %v269_v37 = vld [vmem:[%s1315_s7 + $0x248] sm:$0xff] }
  0x2b   : > { %v271_v38 = vld [vmem:[%s1315_s7 + $0x260] sm:$0xff]  ;;  %268 = vst [vmem:[%s1320_s8 + $0x120] sm:$0xff] %v267_v36  ;;  %270 = vst [vmem:[%s1320_s8 + $0x128] sm:$0xff] %v269_v37  ;;  %v273_v39 = vld [vmem:[%s1315_s7 + $0x268] sm:$0xff] }
  0x2c   : > { %272 = vst [vmem:[%s1320_s8 + $0x130] sm:$0xff] %v271_v38  ;;  %v275_v40 = vld [vmem:[%s1315_s7 + $0x280] sm:$0xff]  ;;  %v277_v41 = vld [vmem:[%s1315_s7 + $0x288] sm:$0xff]  ;;  %274 = vst [vmem:[%s1320_s8 + $0x138] sm:$0xff] %v273_v39 }
  0x2d   : > { %276 = vst [vmem:[%s1320_s8 + $0x140] sm:$0xff] %v275_v40  ;;  %278 = vst [vmem:[%s1320_s8 + $0x148] sm:$0xff] %v277_v41  ;;  %v279_v42 = vld [vmem:[%s1315_s7 + $0x2a0] sm:$0xff]  ;;  %v281_v43 = vld [vmem:[%s1315_s7 + $0x2a8] sm:$0xff] }
  0x2e   : > { %v283_v44 = vld [vmem:[%s1315_s7 + $0x2c0] sm:$0xff]  ;;  %280 = vst [vmem:[%s1320_s8 + $0x150] sm:$0xff] %v279_v42  ;;  %282 = vst [vmem:[%s1320_s8 + $0x158] sm:$0xff] %v281_v43  ;;  %v285_v45 = vld [vmem:[%s1315_s7 + $0x2c8] sm:$0xff] }
  0x2f   : > { %284 = vst [vmem:[%s1320_s8 + $0x160] sm:$0xff] %v283_v44  ;;  %v287_v46 = vld [vmem:[%s1315_s7 + $0x2e0] sm:$0xff]  ;;  %v289_v47 = vld [vmem:[%s1315_s7 + $0x2e8] sm:$0xff]  ;;  %286 = vst [vmem:[%s1320_s8 + $0x168] sm:$0xff] %v285_v45 }
  0x30   : > { %288 = vst [vmem:[%s1320_s8 + $0x170] sm:$0xff] %v287_v46  ;;  %290 = vst [vmem:[%s1320_s8 + $0x178] sm:$0xff] %v289_v47  ;;  %v291_v48 = vld [vmem:[%s1315_s7 + $0x300] sm:$0xff]  ;;  %v293_v49 = vld [vmem:[%s1315_s7 + $0x308] sm:$0xff] }
  0x31   : > { %v295_v50 = vld [vmem:[%s1315_s7 + $0x320] sm:$0xff]  ;;  %292 = vst [vmem:[%s1320_s8 + $0x180] sm:$0xff] %v291_v48  ;;  %294 = vst [vmem:[%s1320_s8 + $0x188] sm:$0xff] %v293_v49  ;;  %v297_v51 = vld [vmem:[%s1315_s7 + $0x328] sm:$0xff] }
  0x32   : > { %296 = vst [vmem:[%s1320_s8 + $0x190] sm:$0xff] %v295_v50  ;;  %v299_v52 = vld [vmem:[%s1315_s7 + $0x340] sm:$0xff]  ;;  %v301_v53 = vld [vmem:[%s1315_s7 + $0x348] sm:$0xff]  ;;  %298 = vst [vmem:[%s1320_s8 + $0x198] sm:$0xff] %v297_v51 }
  0x33   : > { %300 = vst [vmem:[%s1320_s8 + $0x1a0] sm:$0xff] %v299_v52  ;;  %302 = vst [vmem:[%s1320_s8 + $0x1a8] sm:$0xff] %v301_v53  ;;  %v303_v54 = vld [vmem:[%s1315_s7 + $0x360] sm:$0xff]  ;;  %v305_v55 = vld [vmem:[%s1315_s7 + $0x368] sm:$0xff] }
  0x34   : > { %v307_v56 = vld [vmem:[%s1315_s7 + $0x380] sm:$0xff]  ;;  %304 = vst [vmem:[%s1320_s8 + $0x1b0] sm:$0xff] %v303_v54  ;;  %306 = vst [vmem:[%s1320_s8 + $0x1b8] sm:$0xff] %v305_v55  ;;  %v309_v57 = vld [vmem:[%s1315_s7 + $0x388] sm:$0xff] }
  0x35   : > { %308 = vst [vmem:[%s1320_s8 + $0x1c0] sm:$0xff] %v307_v56  ;;  %v311_v58 = vld [vmem:[%s1315_s7 + $0x3a0] sm:$0xff]  ;;  %v313_v59 = vld [vmem:[%s1315_s7 + $0x3a8] sm:$0xff]  ;;  %310 = vst [vmem:[%s1320_s8 + $0x1c8] sm:$0xff] %v309_v57 }
  0x36   : > { %312 = vst [vmem:[%s1320_s8 + $0x1d0] sm:$0xff] %v311_v58  ;;  %314 = vst [vmem:[%s1320_s8 + $0x1d8] sm:$0xff] %v313_v59  ;;  %v315_v60 = vld [vmem:[%s1315_s7 + $0x3c0] sm:$0xff]  ;;  %v317_v61 = vld [vmem:[%s1315_s7 + $0x3c8] sm:$0xff] }
  0x37   : > { %v319_v62 = vld [vmem:[%s1315_s7 + $0x3e0] sm:$0xff]  ;;  %316 = vst [vmem:[%s1320_s8 + $0x1e0] sm:$0xff] %v315_v60  ;;  %318 = vst [vmem:[%s1320_s8 + $0x1e8] sm:$0xff] %v317_v61  ;;  %v321_v63 = vld [vmem:[%s1315_s7 + $0x3e8] sm:$0xff] }
  0x38   : > { %320 = vst [vmem:[%s1320_s8 + $0x1f0] sm:$0xff] %v319_v62  ;;  %v323_v0 = vld [vmem:[%s1315_s7 + $0x400] sm:$0xff]  ;;  %v325_v1 = vld [vmem:[%s1315_s7 + $0x408] sm:$0xff]  ;;  %322 = vst [vmem:[%s1320_s8 + $0x1f8] sm:$0xff] %v321_v63 }
  0x39   : > { %324 = vst [vmem:[%s1320_s8 + $0x200] sm:$0xff] %v323_v0  ;;  %326 = vst [vmem:[%s1320_s8 + $0x208] sm:$0xff] %v325_v1  ;;  %v327_v2 = vld [vmem:[%s1315_s7 + $0x420] sm:$0xff]  ;;  %v329_v3 = vld [vmem:[%s1315_s7 + $0x428] sm:$0xff] }
  0x3a   : > { %v331_v4 = vld [vmem:[%s1315_s7 + $0x440] sm:$0xff]  ;;  %328 = vst [vmem:[%s1320_s8 + $0x210] sm:$0xff] %v327_v2  ;;  %330 = vst [vmem:[%s1320_s8 + $0x218] sm:$0xff] %v329_v3  ;;  %v333_v5 = vld [vmem:[%s1315_s7 + $0x448] sm:$0xff] }
  0x3b   : > { %332 = vst [vmem:[%s1320_s8 + $0x220] sm:$0xff] %v331_v4  ;;  %v335_v6 = vld [vmem:[%s1315_s7 + $0x460] sm:$0xff]  ;;  %v337_v7 = vld [vmem:[%s1315_s7 + $0x468] sm:$0xff]  ;;  %334 = vst [vmem:[%s1320_s8 + $0x228] sm:$0xff] %v333_v5 }
  0x3c   : > { %336 = vst [vmem:[%s1320_s8 + $0x230] sm:$0xff] %v335_v6  ;;  %338 = vst [vmem:[%s1320_s8 + $0x238] sm:$0xff] %v337_v7  ;;  %v339_v8 = vld [vmem:[%s1315_s7 + $0x480] sm:$0xff]  ;;  %v341_v9 = vld [vmem:[%s1315_s7 + $0x488] sm:$0xff] }
  0x3d   : > { %v343_v10 = vld [vmem:[%s1315_s7 + $0x4a0] sm:$0xff]  ;;  %340 = vst [vmem:[%s1320_s8 + $0x240] sm:$0xff] %v339_v8  ;;  %342 = vst [vmem:[%s1320_s8 + $0x248] sm:$0xff] %v341_v9  ;;  %v345_v11 = vld [vmem:[%s1315_s7 + $0x4a8] sm:$0xff] }
  0x3e   : > { %344 = vst [vmem:[%s1320_s8 + $0x250] sm:$0xff] %v343_v10  ;;  %v347_v12 = vld [vmem:[%s1315_s7 + $0x4c0] sm:$0xff]  ;;  %v349_v13 = vld [vmem:[%s1315_s7 + $0x4c8] sm:$0xff]  ;;  %346 = vst [vmem:[%s1320_s8 + $0x258] sm:$0xff] %v345_v11 }
  0x3f   : > { %348 = vst [vmem:[%s1320_s8 + $0x260] sm:$0xff] %v347_v12  ;;  %350 = vst [vmem:[%s1320_s8 + $0x268] sm:$0xff] %v349_v13  ;;  %v351_v14 = vld [vmem:[%s1315_s7 + $0x4e0] sm:$0xff]  ;;  %v353_v15 = vld [vmem:[%s1315_s7 + $0x4e8] sm:$0xff] }
  0x40   : > { %v355_v16 = vld [vmem:[%s1315_s7 + $0x500] sm:$0xff]  ;;  %352 = vst [vmem:[%s1320_s8 + $0x270] sm:$0xff] %v351_v14  ;;  %354 = vst [vmem:[%s1320_s8 + $0x278] sm:$0xff] %v353_v15  ;;  %v357_v17 = vld [vmem:[%s1315_s7 + $0x508] sm:$0xff] }
  0x41   : > { %356 = vst [vmem:[%s1320_s8 + $0x280] sm:$0xff] %v355_v16  ;;  %v359_v18 = vld [vmem:[%s1315_s7 + $0x520] sm:$0xff]  ;;  %v361_v19 = vld [vmem:[%s1315_s7 + $0x528] sm:$0xff]  ;;  %358 = vst [vmem:[%s1320_s8 + $0x288] sm:$0xff] %v357_v17 }
  0x42   : > { %360 = vst [vmem:[%s1320_s8 + $0x290] sm:$0xff] %v359_v18  ;;  %362 = vst [vmem:[%s1320_s8 + $0x298] sm:$0xff] %v361_v19  ;;  %v363_v20 = vld [vmem:[%s1315_s7 + $0x540] sm:$0xff]  ;;  %v365_v21 = vld [vmem:[%s1315_s7 + $0x548] sm:$0xff] }
  0x43   : > { %v367_v22 = vld [vmem:[%s1315_s7 + $0x560] sm:$0xff]  ;;  %364 = vst [vmem:[%s1320_s8 + $0x2a0] sm:$0xff] %v363_v20  ;;  %366 = vst [vmem:[%s1320_s8 + $0x2a8] sm:$0xff] %v365_v21  ;;  %v369_v23 = vld [vmem:[%s1315_s7 + $0x568] sm:$0xff] }
  0x44   : > { %368 = vst [vmem:[%s1320_s8 + $0x2b0] sm:$0xff] %v367_v22  ;;  %v371_v24 = vld [vmem:[%s1315_s7 + $0x580] sm:$0xff]  ;;  %v373_v25 = vld [vmem:[%s1315_s7 + $0x588] sm:$0xff]  ;;  %370 = vst [vmem:[%s1320_s8 + $0x2b8] sm:$0xff] %v369_v23 }
  0x45   : > { %372 = vst [vmem:[%s1320_s8 + $0x2c0] sm:$0xff] %v371_v24  ;;  %374 = vst [vmem:[%s1320_s8 + $0x2c8] sm:$0xff] %v373_v25  ;;  %v375_v26 = vld [vmem:[%s1315_s7 + $0x5a0] sm:$0xff]  ;;  %v377_v27 = vld [vmem:[%s1315_s7 + $0x5a8] sm:$0xff] }
  0x46   : > { %v379_v28 = vld [vmem:[%s1315_s7 + $0x5c0] sm:$0xff]  ;;  %376 = vst [vmem:[%s1320_s8 + $0x2d0] sm:$0xff] %v375_v26  ;;  %378 = vst [vmem:[%s1320_s8 + $0x2d8] sm:$0xff] %v377_v27  ;;  %v381_v29 = vld [vmem:[%s1315_s7 + $0x5c8] sm:$0xff] }
  0x47   : > { %380 = vst [vmem:[%s1320_s8 + $0x2e0] sm:$0xff] %v379_v28  ;;  %v383_v30 = vld [vmem:[%s1315_s7 + $0x5e0] sm:$0xff]  ;;  %v385_v31 = vld [vmem:[%s1315_s7 + $0x5e8] sm:$0xff]  ;;  %382 = vst [vmem:[%s1320_s8 + $0x2e8] sm:$0xff] %v381_v29 }
  0x48   : > { %384 = vst [vmem:[%s1320_s8 + $0x2f0] sm:$0xff] %v383_v30  ;;  %386 = vst [vmem:[%s1320_s8 + $0x2f8] sm:$0xff] %v385_v31  ;;  %v387_v32 = vld [vmem:[%s1315_s7 + $0x600] sm:$0xff]  ;;  %v389_v33 = vld [vmem:[%s1315_s7 + $0x608] sm:$0xff] }
  0x49   : > { %v391_v34 = vld [vmem:[%s1315_s7 + $0x620] sm:$0xff]  ;;  %388 = vst [vmem:[%s1320_s8 + $0x300] sm:$0xff] %v387_v32  ;;  %390 = vst [vmem:[%s1320_s8 + $0x308] sm:$0xff] %v389_v33  ;;  %v393_v35 = vld [vmem:[%s1315_s7 + $0x628] sm:$0xff] }
  0x4a   : > { %392 = vst [vmem:[%s1320_s8 + $0x310] sm:$0xff] %v391_v34  ;;  %v395_v36 = vld [vmem:[%s1315_s7 + $0x640] sm:$0xff]  ;;  %v397_v37 = vld [vmem:[%s1315_s7 + $0x648] sm:$0xff]  ;;  %394 = vst [vmem:[%s1320_s8 + $0x318] sm:$0xff] %v393_v35 }
  0x4b   : > { %396 = vst [vmem:[%s1320_s8 + $0x320] sm:$0xff] %v395_v36  ;;  %398 = vst [vmem:[%s1320_s8 + $0x328] sm:$0xff] %v397_v37  ;;  %v399_v38 = vld [vmem:[%s1315_s7 + $0x660] sm:$0xff]  ;;  %v401_v39 = vld [vmem:[%s1315_s7 + $0x668] sm:$0xff] }
  0x4c   : > { %v403_v40 = vld [vmem:[%s1315_s7 + $0x680] sm:$0xff]  ;;  %400 = vst [vmem:[%s1320_s8 + $0x330] sm:$0xff] %v399_v38  ;;  %402 = vst [vmem:[%s1320_s8 + $0x338] sm:$0xff] %v401_v39  ;;  %v405_v41 = vld [vmem:[%s1315_s7 + $0x688] sm:$0xff] }
  0x4d   : > { %404 = vst [vmem:[%s1320_s8 + $0x340] sm:$0xff] %v403_v40  ;;  %v407_v42 = vld [vmem:[%s1315_s7 + $0x6a0] sm:$0xff]  ;;  %v409_v43 = vld [vmem:[%s1315_s7 + $0x6a8] sm:$0xff]  ;;  %406 = vst [vmem:[%s1320_s8 + $0x348] sm:$0xff] %v405_v41 }
  0x4e   : > { %408 = vst [vmem:[%s1320_s8 + $0x350] sm:$0xff] %v407_v42  ;;  %410 = vst [vmem:[%s1320_s8 + $0x358] sm:$0xff] %v409_v43  ;;  %v411_v44 = vld [vmem:[%s1315_s7 + $0x6c0] sm:$0xff]  ;;  %v413_v45 = vld [vmem:[%s1315_s7 + $0x6c8] sm:$0xff] }
  0x4f   : > { %v415_v46 = vld [vmem:[%s1315_s7 + $0x6e0] sm:$0xff]  ;;  %412 = vst [vmem:[%s1320_s8 + $0x360] sm:$0xff] %v411_v44  ;;  %414 = vst [vmem:[%s1320_s8 + $0x368] sm:$0xff] %v413_v45  ;;  %v417_v47 = vld [vmem:[%s1315_s7 + $0x6e8] sm:$0xff] }
  0x50   : > { %416 = vst [vmem:[%s1320_s8 + $0x370] sm:$0xff] %v415_v46  ;;  %v419_v48 = vld [vmem:[%s1315_s7 + $0x700] sm:$0xff]  ;;  %v421_v49 = vld [vmem:[%s1315_s7 + $0x708] sm:$0xff]  ;;  %418 = vst [vmem:[%s1320_s8 + $0x378] sm:$0xff] %v417_v47 }
  0x51   : > { %420 = vst [vmem:[%s1320_s8 + $0x380] sm:$0xff] %v419_v48  ;;  %422 = vst [vmem:[%s1320_s8 + $0x388] sm:$0xff] %v421_v49  ;;  %v423_v50 = vld [vmem:[%s1315_s7 + $0x720] sm:$0xff]  ;;  %v425_v51 = vld [vmem:[%s1315_s7 + $0x728] sm:$0xff] }
  0x52   : > { %v427_v52 = vld [vmem:[%s1315_s7 + $0x740] sm:$0xff]  ;;  %424 = vst [vmem:[%s1320_s8 + $0x390] sm:$0xff] %v423_v50  ;;  %426 = vst [vmem:[%s1320_s8 + $0x398] sm:$0xff] %v425_v51  ;;  %v429_v53 = vld [vmem:[%s1315_s7 + $0x748] sm:$0xff] }
  0x53   : > { %428 = vst [vmem:[%s1320_s8 + $0x3a0] sm:$0xff] %v427_v52  ;;  %v431_v54 = vld [vmem:[%s1315_s7 + $0x760] sm:$0xff]  ;;  %v433_v55 = vld [vmem:[%s1315_s7 + $0x768] sm:$0xff]  ;;  %430 = vst [vmem:[%s1320_s8 + $0x3a8] sm:$0xff] %v429_v53 }
  0x54   : > { %432 = vst [vmem:[%s1320_s8 + $0x3b0] sm:$0xff] %v431_v54  ;;  %434 = vst [vmem:[%s1320_s8 + $0x3b8] sm:$0xff] %v433_v55  ;;  %v435_v56 = vld [vmem:[%s1315_s7 + $0x780] sm:$0xff]  ;;  %v437_v57 = vld [vmem:[%s1315_s7 + $0x788] sm:$0xff] }
  0x55   : > { %v439_v58 = vld [vmem:[%s1315_s7 + $0x7a0] sm:$0xff]  ;;  %436 = vst [vmem:[%s1320_s8 + $0x3c0] sm:$0xff] %v435_v56  ;;  %438 = vst [vmem:[%s1320_s8 + $0x3c8] sm:$0xff] %v437_v57  ;;  %v441_v59 = vld [vmem:[%s1315_s7 + $0x7a8] sm:$0xff] }
  0x56   : > { %440 = vst [vmem:[%s1320_s8 + $0x3d0] sm:$0xff] %v439_v58  ;;  %v443_v60 = vld [vmem:[%s1315_s7 + $0x7c0] sm:$0xff]  ;;  %v445_v61 = vld [vmem:[%s1315_s7 + $0x7c8] sm:$0xff]  ;;  %442 = vst [vmem:[%s1320_s8 + $0x3d8] sm:$0xff] %v441_v59 }
  0x57   : > { %444 = vst [vmem:[%s1320_s8 + $0x3e0] sm:$0xff] %v443_v60  ;;  %446 = vst [vmem:[%s1320_s8 + $0x3e8] sm:$0xff] %v445_v61  ;;  %v447_v62 = vld [vmem:[%s1315_s7 + $0x7e0] sm:$0xff]  ;;  %v449_v63 = vld [vmem:[%s1315_s7 + $0x7e8] sm:$0xff] }
  0x58   : > { %448 = vst [vmem:[%s1320_s8 + $0x3f0] sm:$0xff] %v447_v62  ;;  %450 = vst [vmem:[%s1320_s8 + $0x3f8] sm:$0xff] %v449_v63 }
  0x59 PF: > { %p979_p7 = scmp.ge.s32.totalorder %s1232_s18, 1  ;;  %p463_p8 = scmp.lt.s32.totalorder %s1232_s18, 7 }
  0x5b   : > { %p464_p9 = pnand %p979_p7, %p463_p8 }
  0x5c   : > { %s470_s9 = sand.u32 (!%p464_p9), 1, %s1208_s12   ;;  %s981_s10 = sshll.u32 (!%p464_p9), %s1216_s14, 2 }
  0x5d   : > { %467 = sbr.rel (%p464_p9) target bundleno = 408 (0x198), region = 51  ;;  %s980_s11 = sshll.u32 (!%p464_p9), %s470_s9, 10 }
  0x5e   : > { %p513_p10 = scmp.lt.s32.totalorder (!%p464_p9), %s981_s10, 11  ;;  %s983_s21 = sshll.u32 (!%p464_p9), %s1220_s15, 1 }
  0x5f   : > { %p523_p11 = scmp.lt.s32.totalorder (!%p464_p9), %s983_s21, 3  ;;  %s1597_s5 = scalar_lea.vmem (!%p464_p9), [#allocation3], %s980_s11 }
  0x60   : > { %p986_p12 = scmp.ne.s32.totalorder (!%p464_p9), %s1216_s14, 0 }
  0x64   : > { %s1778_s10 = smov (!%p513_p10, %s981_s10), 11  ;;  %s1780_s21 = smov (!%p523_p11, %s983_s21), 3 }
  0x65   : > { %s982_s22 = sshll.u32 %s1778_s10, 3  ;;  %s525_s12 = scalar_lea.vmem %s1763_s2, %s1780_s21  ;;  %v1234_v0 = vmov (!%p986_p12), 0.0  }
  0x66   : > { %s1583_s26 = scalar_lea.vmem %s1761_s0, %s982_s22  ;;  %s985_s29 = sshll.u32 %s1780_s21, 3  ;;  %541 = vst [vmem:[#allocation2] sm:$0xff] (!%p986_p12), %v1234_v0  ;;  %542 = vst [vmem:[#allocation2 + $0x8] sm:$0xff] (!%p986_p12), %v1234_v0 }
  0x67   : > { %s1595_s15 = scalar_lea.vmem %s1764_s3, %s985_s29  ;;  %540 = sbr.rel (%p986_p12) target bundleno = 110 (0x6e), region = 59 }
  0x6e PF: > { %v550_v1 = vld [vmem:[%s1597_s5 + $0x8] sm:$0xff]  ;;  %v552_v2 = vld [vmem:[%s1597_s5 + $0x18] sm:$0xff]  ;;  %v549_v6 = vld [vmem:[%s1597_s5] sm:$0xff]  ;;  %p987_p13 = scmp.ne.s32.totalorder %s1216_s14, 2 }
  0x6f   : > { %v614_v3 = vld [vmem:[%s1597_s5 + $0x208] sm:$0xff]  ;;  %v991_v4 = vpack.c.bf16 %v552_v2, %v550_v1  ;;  %v616_v5 = vld [vmem:[%s1597_s5 + $0x218] sm:$0xff]  ;;  %v551_v7 = vld [vmem:[%s1597_s5 + $0x10] sm:$0xff] }
  0x70   : > { %v1055_v8 = vpack.c.bf16 %v616_v5, %v614_v3  ;;  %v993_v9 = vpack.c.bf16 %v551_v7, %v549_v6  ;;  %v613_v10 = vld [vmem:[%s1597_s5 + $0x200] sm:$0xff]  ;;  %v615_v11 = vld [vmem:[%s1597_s5 + $0x210] sm:$0xff]  ;;  %v554_v12 = vld [vmem:[%s1597_s5 + $0x28] sm:$0xff] }
  0x71   : > { %992 = vmatprep.subr.bf16.mxu1 %v991_v4  ;;  %v1057_v13 = vpack.c.bf16 %v615_v11, %v613_v10  ;;  %v556_v14 = vld [vmem:[%s1597_s5 + $0x38] sm:$0xff]  ;;  %v618_v15 = vld [vmem:[%s1597_s5 + $0x228] sm:$0xff]  ;;  %v553_v19 = vld [vmem:[%s1597_s5 + $0x20] sm:$0xff] }
  0x72   : > { %v620_v16 = vld [vmem:[%s1597_s5 + $0x238] sm:$0xff]  ;;  %1056 = vmatprep.subr.bf16.mxu0 %v1055_v8  ;;  %994 = vmatpush1.bf16.msra.mxu1 %v993_v9  ;;  %v995_v17 = vpack.c.bf16 %v556_v14, %v554_v12  ;;  %v555_v20 = vld [vmem:[%s1597_s5 + $0x30] sm:$0xff]  ;;  %v617_v21 = vld [vmem:[%s1597_s5 + $0x220] sm:$0xff] }
  0x73   : > { %v1059_v18 = vpack.c.bf16 %v620_v16, %v618_v15  ;;  %1058 = vmatpush1.bf16.msra.mxu0 %v1057_v13  ;;  %v997_v22 = vpack.c.bf16 %v555_v20, %v553_v19  ;;  %v619_v23 = vld [vmem:[%s1597_s5 + $0x230] sm:$0xff]  ;;  %v558_v24 = vld [vmem:[%s1597_s5 + $0x48] sm:$0xff]  ;;  %v560_v25 = vld [vmem:[%s1597_s5 + $0x58] sm:$0xff] }
  0x74   : > { %996 = vmatprep.subr.bf16.mxu1 %v995_v17  ;;  %v1061_v26 = vpack.c.bf16 %v619_v23, %v617_v21  ;;  %v999_v27 = vpack.c.bf16 %v560_v25, %v558_v24  ;;  %v622_v28 = vld [vmem:[%s1597_s5 + $0x248] sm:$0xff]  ;;  %v624_v29 = vld [vmem:[%s1597_s5 + $0x258] sm:$0xff]  ;;  %v557_v30 = vld [vmem:[%s1597_s5 + $0x40] sm:$0xff] }
  0x75   : > { %1060 = vmatprep.subr.bf16.mxu0 %v1059_v18  ;;  %v1063_v31 = vpack.c.bf16 %v624_v29, %v622_v28  ;;  %v559_v32 = vld [vmem:[%s1597_s5 + $0x50] sm:$0xff]  ;;  %v621_v33 = vld [vmem:[%s1597_s5 + $0x240] sm:$0xff]  ;;  %v562_v36 = vld [vmem:[%s1597_s5 + $0x68] sm:$0xff] }
  0x76   : > { %v623_v34 = vld [vmem:[%s1597_s5 + $0x250] sm:$0xff]  ;;  %998 = vmatpush1.bf16.msra.mxu1 %v997_v22  ;;  %v1001_v35 = vpack.c.bf16 %v559_v32, %v557_v30  ;;  %v564_v37 = vld [vmem:[%s1597_s5 + $0x78] sm:$0xff]  ;;  %v626_v38 = vld [vmem:[%s1597_s5 + $0x268] sm:$0xff] }
  0x77   : > { %1062 = vmatpush1.bf16.msra.mxu0 %v1061_v26  ;;  %1000 = vmatprep.subr.bf16.mxu1 %v999_v27  ;;  %v1065_v39 = vpack.c.bf16 %v623_v34, %v621_v33  ;;  %v1003_v40 = vpack.c.bf16 %v564_v37, %v562_v36  ;;  %v628_v41 = vld [vmem:[%s1597_s5 + $0x278] sm:$0xff]  ;;  %v561_v42 = vld [vmem:[%s1597_s5 + $0x60] sm:$0xff]  ;;  %v563_v43 = vld [vmem:[%s1597_s5 + $0x70] sm:$0xff] }
  0x78   : > { %1064 = vmatprep.subr.bf16.mxu0 %v1063_v31  ;;  %v1067_v44 = vpack.c.bf16 %v628_v41, %v626_v38  ;;  %v625_v45 = vld [vmem:[%s1597_s5 + $0x260] sm:$0xff]  ;;  %v627_v46 = vld [vmem:[%s1597_s5 + $0x270] sm:$0xff]  ;;  %v566_v47 = vld [vmem:[%s1597_s5 + $0x88] sm:$0xff]  ;;  %v1005_v51 = vpack.c.bf16 %v563_v43, %v561_v42 }
  0x79   : > { %v568_v48 = vld [vmem:[%s1597_s5 + $0x98] sm:$0xff]  ;;  %v630_v49 = vld [vmem:[%s1597_s5 + $0x288] sm:$0xff]  ;;  %v1069_v52 = vpack.c.bf16 %v627_v46, %v625_v45  ;;  %v565_v54 = vld [vmem:[%s1597_s5 + $0x80] sm:$0xff] }
  0x7a   : > { %v632_v50 = vld [vmem:[%s1597_s5 + $0x298] sm:$0xff]  ;;  %1002 = vmatpush1.bf16.msra.mxu1 %v1001_v35  ;;  %v1007_v53 = vpack.c.bf16 %v568_v48, %v566_v47  ;;  %v567_v55 = vld [vmem:[%s1597_s5 + $0x90] sm:$0xff]  ;;  %v629_v56 = vld [vmem:[%s1597_s5 + $0x280] sm:$0xff] }
  0x7b   : > { %1066 = vmatpush1.bf16.msra.mxu0 %v1065_v39  ;;  %1004 = vmatprep.subr.bf16.mxu1 %v1003_v40  ;;  %v1071_v57 = vpack.c.bf16 %v632_v50, %v630_v49  ;;  %v631_v58 = vld [vmem:[%s1597_s5 + $0x290] sm:$0xff]  ;;  %v570_v59 = vld [vmem:[%s1597_s5 + $0xa8] sm:$0xff]  ;;  %v572_v60 = vld [vmem:[%s1597_s5 + $0xb8] sm:$0xff]  ;;  %v1009_v63 = vpack.c.bf16 %v567_v55, %v565_v54 }
  0x7c   : > { %1068 = vmatprep.subr.bf16.mxu0 %v1067_v44  ;;  %v634_v61 = vld [vmem:[%s1597_s5 + $0x2a8] sm:$0xff]  ;;  %v636_v62 = vld [vmem:[%s1597_s5 + $0x2b8] sm:$0xff]  ;;  %v1073_v0 = vpack.c.bf16 %v631_v58, %v629_v56  ;;  %v1011_v1 = vpack.c.bf16 %v572_v60, %v570_v59  ;;  %v569_v2 = vld [vmem:[%s1597_s5 + $0xa0] sm:$0xff] }
  0x7d   : > { %v571_v3 = vld [vmem:[%s1597_s5 + $0xb0] sm:$0xff]  ;;  %v633_v4 = vld [vmem:[%s1597_s5 + $0x2a0] sm:$0xff]  ;;  %v1075_v5 = vpack.c.bf16 %v636_v62, %v634_v61  ;;  %v574_v7 = vld [vmem:[%s1597_s5 + $0xc8] sm:$0xff] }
  0x7e   : > { %1006 = vmatpush1.bf16.msra.mxu1 %v1005_v51  ;;  %v635_v6 = vld [vmem:[%s1597_s5 + $0x2b0] sm:$0xff]  ;;  %v576_v8 = vld [vmem:[%s1597_s5 + $0xd8] sm:$0xff]  ;;  %v638_v9 = vld [vmem:[%s1597_s5 + $0x2c8] sm:$0xff]  ;;  %v1013_v11 = vpack.c.bf16 %v571_v3, %v569_v2 }
  0x7f   : > { %1070 = vmatpush1.bf16.msra.mxu0 %v1069_v52  ;;  %1008 = vmatprep.subr.bf16.mxu1 %v1007_v53  ;;  %v640_v10 = vld [vmem:[%s1597_s5 + $0x2d8] sm:$0xff]  ;;  %v1077_v12 = vpack.c.bf16 %v635_v6, %v633_v4  ;;  %v1015_v13 = vpack.c.bf16 %v576_v8, %v574_v7  ;;  %v573_v14 = vld [vmem:[%s1597_s5 + $0xc0] sm:$0xff]  ;;  %v575_v15 = vld [vmem:[%s1597_s5 + $0xd0] sm:$0xff] }
  0x80   : > { %1072 = vmatprep.subr.bf16.mxu0 %v1071_v57  ;;  %v637_v16 = vld [vmem:[%s1597_s5 + $0x2c0] sm:$0xff]  ;;  %v1079_v17 = vpack.c.bf16 %v640_v10, %v638_v9  ;;  %v639_v18 = vld [vmem:[%s1597_s5 + $0x2d0] sm:$0xff]  ;;  %v578_v19 = vld [vmem:[%s1597_s5 + $0xe8] sm:$0xff]  ;;  %v1017_v23 = vpack.c.bf16 %v575_v15, %v573_v14 }
  0x81   : > { %v580_v20 = vld [vmem:[%s1597_s5 + $0xf8] sm:$0xff]  ;;  %v642_v21 = vld [vmem:[%s1597_s5 + $0x2e8] sm:$0xff]  ;;  %v1081_v24 = vpack.c.bf16 %v639_v18, %v637_v16  ;;  %v577_v26 = vld [vmem:[%s1597_s5 + $0xe0] sm:$0xff] }
  0x82   : > { %1010 = vmatpush1.bf16.msra.mxu1 %v1009_v63  ;;  %v644_v22 = vld [vmem:[%s1597_s5 + $0x2f8] sm:$0xff]  ;;  %v1019_v25 = vpack.c.bf16 %v580_v20, %v578_v19  ;;  %v579_v27 = vld [vmem:[%s1597_s5 + $0xf0] sm:$0xff]  ;;  %v641_v28 = vld [vmem:[%s1597_s5 + $0x2e0] sm:$0xff] }
  0x83   : > { %1074 = vmatpush1.bf16.msra.mxu0 %v1073_v0  ;;  %1012 = vmatprep.subr.bf16.mxu1 %v1011_v1  ;;  %v1083_v29 = vpack.c.bf16 %v644_v22, %v642_v21  ;;  %v643_v30 = vld [vmem:[%s1597_s5 + $0x2f0] sm:$0xff]  ;;  %v582_v31 = vld [vmem:[%s1597_s5 + $0x108] sm:$0xff]  ;;  %v584_v32 = vld [vmem:[%s1597_s5 + $0x118] sm:$0xff]  ;;  %v1021_v35 = vpack.c.bf16 %v579_v27, %v577_v26 }
  0x84   : > { %1076 = vmatprep.subr.bf16.mxu0 %v1075_v5  ;;  %v646_v33 = vld [vmem:[%s1597_s5 + $0x308] sm:$0xff]  ;;  %v648_v34 = vld [vmem:[%s1597_s5 + $0x318] sm:$0xff]  ;;  %v1085_v36 = vpack.c.bf16 %v643_v30, %v641_v28  ;;  %v1023_v37 = vpack.c.bf16 %v584_v32, %v582_v31  ;;  %v581_v38 = vld [vmem:[%s1597_s5 + $0x100] sm:$0xff] }
  0x85   : > { %v583_v39 = vld [vmem:[%s1597_s5 + $0x110] sm:$0xff]  ;;  %v645_v40 = vld [vmem:[%s1597_s5 + $0x300] sm:$0xff]  ;;  %v1087_v41 = vpack.c.bf16 %v648_v34, %v646_v33  ;;  %v586_v43 = vld [vmem:[%s1597_s5 + $0x128] sm:$0xff] }
  0x86   : > { %1014 = vmatpush1.bf16.msra.mxu1 %v1013_v11  ;;  %v647_v42 = vld [vmem:[%s1597_s5 + $0x310] sm:$0xff]  ;;  %v588_v44 = vld [vmem:[%s1597_s5 + $0x138] sm:$0xff]  ;;  %v650_v45 = vld [vmem:[%s1597_s5 + $0x328] sm:$0xff]  ;;  %v1025_v47 = vpack.c.bf16 %v583_v39, %v581_v38 }
  0x87   : > { %1078 = vmatpush1.bf16.msra.mxu0 %v1077_v12  ;;  %1016 = vmatprep.subr.bf16.mxu1 %v1015_v13  ;;  %v652_v46 = vld [vmem:[%s1597_s5 + $0x338] sm:$0xff]  ;;  %v1089_v48 = vpack.c.bf16 %v647_v42, %v645_v40  ;;  %v1027_v49 = vpack.c.bf16 %v588_v44, %v586_v43  ;;  %v585_v50 = vld [vmem:[%s1597_s5 + $0x120] sm:$0xff]  ;;  %v587_v51 = vld [vmem:[%s1597_s5 + $0x130] sm:$0xff] }
  0x88   : > { %1080 = vmatprep.subr.bf16.mxu0 %v1079_v17  ;;  %v649_v52 = vld [vmem:[%s1597_s5 + $0x320] sm:$0xff]  ;;  %v1091_v53 = vpack.c.bf16 %v652_v46, %v650_v45  ;;  %v651_v54 = vld [vmem:[%s1597_s5 + $0x330] sm:$0xff]  ;;  %v590_v55 = vld [vmem:[%s1597_s5 + $0x148] sm:$0xff]  ;;  %v1029_v59 = vpack.c.bf16 %v587_v51, %v585_v50 }
  0x89   : > { %v592_v56 = vld [vmem:[%s1597_s5 + $0x158] sm:$0xff]  ;;  %v654_v57 = vld [vmem:[%s1597_s5 + $0x348] sm:$0xff]  ;;  %v1093_v60 = vpack.c.bf16 %v651_v54, %v649_v52  ;;  %v589_v62 = vld [vmem:[%s1597_s5 + $0x140] sm:$0xff] }
  0x8a   : > { %1018 = vmatpush1.bf16.msra.mxu1 %v1017_v23  ;;  %v656_v58 = vld [vmem:[%s1597_s5 + $0x358] sm:$0xff]  ;;  %v1031_v61 = vpack.c.bf16 %v592_v56, %v590_v55  ;;  %v591_v63 = vld [vmem:[%s1597_s5 + $0x150] sm:$0xff]  ;;  %v653_v0 = vld [vmem:[%s1597_s5 + $0x340] sm:$0xff] }
  0x8b   : > { %1082 = vmatpush1.bf16.msra.mxu0 %v1081_v24  ;;  %1020 = vmatprep.subr.bf16.mxu1 %v1019_v25  ;;  %v1095_v1 = vpack.c.bf16 %v656_v58, %v654_v57  ;;  %v655_v2 = vld [vmem:[%s1597_s5 + $0x350] sm:$0xff]  ;;  %v594_v3 = vld [vmem:[%s1597_s5 + $0x168] sm:$0xff]  ;;  %v596_v4 = vld [vmem:[%s1597_s5 + $0x178] sm:$0xff]  ;;  %v1033_v7 = vpack.c.bf16 %v591_v63, %v589_v62 }
  0x8c   : > { %1084 = vmatprep.subr.bf16.mxu0 %v1083_v29  ;;  %v658_v5 = vld [vmem:[%s1597_s5 + $0x368] sm:$0xff]  ;;  %v660_v6 = vld [vmem:[%s1597_s5 + $0x378] sm:$0xff]  ;;  %v593_v8 = vld [vmem:[%s1597_s5 + $0x160] sm:$0xff]  ;;  %v1097_v9 = vpack.c.bf16 %v655_v2, %v653_v0  ;;  %v1035_v10 = vpack.c.bf16 %v596_v4, %v594_v3 }
  0x8d   : > { %v595_v11 = vld [vmem:[%s1597_s5 + $0x170] sm:$0xff]  ;;  %v657_v12 = vld [vmem:[%s1597_s5 + $0x360] sm:$0xff]  ;;  %v1099_v14 = vpack.c.bf16 %v660_v6, %v658_v5  ;;  %v598_v15 = vld [vmem:[%s1597_s5 + $0x188] sm:$0xff] }
  0x8e   : > { %1022 = vmatpush1.bf16.msra.mxu1 %v1021_v35  ;;  %v659_v13 = vld [vmem:[%s1597_s5 + $0x370] sm:$0xff]  ;;  %v600_v16 = vld [vmem:[%s1597_s5 + $0x198] sm:$0xff]  ;;  %v662_v18 = vld [vmem:[%s1597_s5 + $0x388] sm:$0xff]  ;;  %v1037_v21 = vpack.c.bf16 %v595_v11, %v593_v8 }
  0x8f   : > { %1086 = vmatpush1.bf16.msra.mxu0 %v1085_v36  ;;  %1024 = vmatprep.subr.bf16.mxu1 %v1023_v37  ;;  %v546_v17 = vld [vmem:[%s1583_s26 + $0x8] sm:$0xff]  ;;  %v548_v20 = vld [vmem:[%s1583_s26 + $0x18] sm:$0xff]  ;;  %v1101_v22 = vpack.c.bf16 %v659_v13, %v657_v12  ;;  %v1039_v23 = vpack.c.bf16 %v600_v16, %v598_v15  ;;  %v597_v24 = vld [vmem:[%s1597_s5 + $0x180] sm:$0xff]  ;;  %v831_v15 = vlaneseq (!%p987_p13) }
  0x90   : > { %1088 = vmatprep.subr.bf16.mxu0 %v1087_v41  ;;  %v664_v19 = vld [vmem:[%s1597_s5 + $0x398] sm:$0xff]  ;;  %741 = vmatprep.mubr.f32.mxu1 %v546_v17  ;;  %v599_v25 = vld [vmem:[%s1597_s5 + $0x190] sm:$0xff]  ;;  %v661_v26 = vld [vmem:[%s1597_s5 + $0x380] sm:$0xff] }
  0x91   : > { %812 = vmatprep.mubr.f32.mxu0 %v548_v20  ;;  %v1103_v27 = vpack.c.bf16 %v664_v19, %v662_v18  ;;  %v663_v28 = vld [vmem:[%s1597_s5 + $0x390] sm:$0xff]  ;;  %v602_v29 = vld [vmem:[%s1597_s5 + $0x1a8] sm:$0xff]  ;;  %v604_v30 = vld [vmem:[%s1597_s5 + $0x1b8] sm:$0xff]  ;;  %v1041_v33 = vpack.c.bf16 %v599_v25, %v597_v24  ;;  %v832_v16 = vshrl.u32 (!%p987_p13), %v831_v15, 7 }
  0x92   : > { %1026 = vmatpush1.bf16.msra.mxu1 %v1025_v47  ;;  %v666_v31 = vld [vmem:[%s1597_s5 + $0x3a8] sm:$0xff]  ;;  %v668_v32 = vld [vmem:[%s1597_s5 + $0x3b8] sm:$0xff]  ;;  %v1105_v34 = vpack.c.bf16 %v663_v28, %v661_v26  ;;  %v1043_v35 = vpack.c.bf16 %v604_v30, %v602_v29  ;;  %v601_v36 = vld [vmem:[%s1597_s5 + $0x1a0] sm:$0xff] }
  0x93   : > { %1090 = vmatpush1.bf16.msra.mxu0 %v1089_v48  ;;  %1028 = vmatprep.subr.bf16.mxu1 %v1027_v49  ;;  %v603_v37 = vld [vmem:[%s1597_s5 + $0x1b0] sm:$0xff]  ;;  %v665_v38 = vld [vmem:[%s1597_s5 + $0x3a0] sm:$0xff]  ;;  %v1107_v39 = vpack.c.bf16 %v668_v32, %v666_v31  ;;  %v606_v41 = vld [vmem:[%s1597_s5 + $0x1c8] sm:$0xff]  ;;  %v833_v18 = vsub.s32 (!%p987_p13), 0, %v832_v16  ;;  %v837_v19 = vsub.s32 (!%p987_p13), 1, %v832_v16 }
  0x94   : > { %1092 = vmatprep.subr.bf16.mxu0 %v1091_v53  ;;  %v667_v40 = vld [vmem:[%s1597_s5 + $0x3b0] sm:$0xff]  ;;  %v608_v42 = vld [vmem:[%s1597_s5 + $0x1d8] sm:$0xff]  ;;  %v670_v43 = vld [vmem:[%s1597_s5 + $0x3c8] sm:$0xff]  ;;  %v1045_v45 = vpack.c.bf16 %v603_v37, %v601_v36 }
  0x95   : > { %v672_v44 = vld [vmem:[%s1597_s5 + $0x3d8] sm:$0xff]  ;;  %v1109_v46 = vpack.c.bf16 %v667_v40, %v665_v38  ;;  %v1047_v47 = vpack.c.bf16 %v608_v42, %v606_v41  ;;  %v605_v48 = vld [vmem:[%s1597_s5 + $0x1c0] sm:$0xff]  ;;  %v607_v49 = vld [vmem:[%s1597_s5 + $0x1d0] sm:$0xff] }
  0x96   : > { %1030 = vmatpush1.bf16.msra.mxu1 %v1029_v59  ;;  %v669_v50 = vld [vmem:[%s1597_s5 + $0x3c0] sm:$0xff]  ;;  %v1111_v51 = vpack.c.bf16 %v672_v44, %v670_v43  ;;  %v671_v52 = vld [vmem:[%s1597_s5 + $0x3d0] sm:$0xff]  ;;  %v610_v53 = vld [vmem:[%s1597_s5 + $0x1e8] sm:$0xff]  ;;  %v1049_v57 = vpack.c.bf16 %v607_v49, %v605_v48 }
  0x97   : > { %1094 = vmatpush1.bf16.msra.mxu0 %v1093_v60  ;;  %1032 = vmatprep.subr.bf16.mxu1 %v1031_v61  ;;  %v612_v54 = vld [vmem:[%s1597_s5 + $0x1f8] sm:$0xff]  ;;  %v674_v55 = vld [vmem:[%s1597_s5 + $0x3e8] sm:$0xff]  ;;  %v1113_v58 = vpack.c.bf16 %v671_v52, %v669_v50  ;;  %v609_v60 = vld [vmem:[%s1597_s5 + $0x1e0] sm:$0xff] }
  0x98   : > { %1096 = vmatprep.subr.bf16.mxu0 %v1095_v1  ;;  %v676_v56 = vld [vmem:[%s1597_s5 + $0x3f8] sm:$0xff]  ;;  %v1051_v59 = vpack.c.bf16 %v612_v54, %v610_v53  ;;  %v611_v61 = vld [vmem:[%s1597_s5 + $0x1f0] sm:$0xff]  ;;  %v673_v63 = vld [vmem:[%s1597_s5 + $0x3e0] sm:$0xff] }
  0x99   : > { %v1115_v62 = vpack.c.bf16 %v676_v56, %v674_v55  ;;  %v675_v0 = vld [vmem:[%s1597_s5 + $0x3f0] sm:$0xff]  ;;  %v1053_v1 = vpack.c.bf16 %v611_v61, %v609_v60  ;;  %v547_v4 = vld [vmem:[%s1583_s26 + $0x10] sm:$0xff] }
  0x9a   : > { %1034 = vmatpush1.bf16.msra.mxu1 %v1033_v7  ;;  %v1117_v2 = vpack.c.bf16 %v675_v0, %v673_v63  ;;  %v545_v3 = vld [vmem:[%s1583_s26] sm:$0xff] }
  0x9b   : > { %1098 = vmatpush1.bf16.msra.mxu0 %v1097_v9  ;;  %1036 = vmatprep.subr.bf16.mxu1 %v1035_v10  ;;  %v543_v6 = vld [vmem:[#allocation2] sm:$0xff]  ;;  %v544_v10 = vld [vmem:[#allocation2 + $0x8] sm:$0xff] }
  0x9c   : > { %1100 = vmatprep.subr.bf16.mxu0 %v1099_v14  ;;  %v829_v17 = vld [vmem:[%s525_s12] sm:$0x3] (!%p987_p13) }
  0x9e   : > { %1038 = vmatpush1.bf16.msra.mxu1 %v1037_v21 }
  0x9f   : > { %1102 = vmatpush1.bf16.msra.mxu0 %v1101_v22  ;;  %1040 = vmatprep.subr.bf16.mxu1 %v1039_v23  ;;  %v834_v22 = vrot.slane (!%p987_p13), %v829_v17, %v833_v18  ;;  %v838_v23 = vrot.slane (!%p987_p13), %v829_v17, %v837_v19 }
  0xa0   : > { %1104 = vmatprep.subr.bf16.mxu0 %v1103_v27 }
  0xa2   : > { %1042 = vmatpush1.bf16.msra.mxu1 %v1041_v33 }
  0xa3   : > { %1106 = vmatpush1.bf16.msra.mxu0 %v1105_v34  ;;  %1044 = vmatprep.subr.bf16.mxu1 %v1043_v35 }
  0xa4   : > { %1108 = vmatprep.subr.bf16.mxu0 %v1107_v39 }
  0xa6   : > { %1046 = vmatpush1.bf16.msra.mxu1 %v1045_v45 }
  0xa7   : > { %1110 = vmatpush1.bf16.msra.mxu0 %v1109_v46  ;;  %1048 = vmatprep.subr.bf16.mxu1 %v1047_v47 }
  0xa8   : > { %1112 = vmatprep.subr.bf16.mxu0 %v1111_v51 }
  0xaa   : > { %1050 = vmatpush1.bf16.msra.mxu1 %v1049_v57 }
  0xab   : > { %1114 = vmatpush1.bf16.msra.mxu0 %v1113_v58  ;;  %1052 = vmatprep.subr.bf16.mxu1 %v1051_v59 }
  0xac   : > { %1116 = vmatprep.subr.bf16.mxu0 %v1115_v62 }
  0xae   : > { %1054 = vmatpush1.bf16.msra.mxu1 %v1053_v1 }
  0xaf   : > { %1118 = vmatpush1.bf16.msra.mxu0 %v1117_v2 }
  0xb1   : > { %742 = vmatmul.mubr.f32.vlgmr.msra.gmra.mrb[0].mxu1 %v545_v3 }
  0xb2   : > { %813 = vmatmul.mubr.f32.vlgmr.msra.gmra.mrb[0].mxu0 %v547_v4 }
 0x184   : > { %v743_v5 = vpop.f32.mrb[0].mxu1 }
 0x185   : > { %v814_v7 = vpop.f32.mrb[0].mxu0  ;;  %v745_v8 = vpop.f32.mrb[1].mxu1  ;;  %826 = sbr.rel (%p987_p13) target bundleno = 408 (0x198), region = 63 }
 0x186   : > { %v815_v9 = vadd.f32 %v814_v7, %v743_v5  ;;  %v816_v11 = vpop.f32.mrb[1].mxu0 }
 0x187   : > { %v817_v12 = vadd.f32 %v816_v11, %v745_v8 }
 0x188   : > { %v819_v13 = vadd.f32 %v815_v9, %v543_v6 }
 0x189   : > { %v820_v14 = vadd.f32 %v817_v12, %v544_v10 }
 0x18a   : > { %821 = vst [vmem:[#allocation2] sm:$0xff] %v819_v13 }
 0x18b   : > { %822 = vst [vmem:[#allocation2 + $0x8] sm:$0xff] %v820_v14 }
 0x191   : > { %v827_v20 = vld [vmem:[#allocation2] sm:$0xff] }
 0x192   : > { %v828_v21 = vld [vmem:[#allocation2 + $0x8] sm:$0xff]  ;;  %v841_v24 = vadd.f32 %v834_v22, %v827_v20 }
 0x193   : > { %v842_v25 = vadd.f32 %v838_v23, %v828_v21 }
 0x194   : > { %v843_v26 = vmax.f32 %v841_v24, 0.0 }
 0x195   : > { %v844_v27 = vmax.f32 %v842_v25, 0.0 }
 0x196   : > { %845 = vst [vmem:[%s1595_s15] sm:$0xff] %v843_v26 }
 0x197   : > { %846 = vst [vmem:[%s1595_s15 + $0x8] sm:$0xff] %v844_v27 }
 0x198 PF: > { %s13_s18 = sadd.s32 1, %s1232_s18   ;;  %s1765_s12 = smov %s1212_s13 }
 0x199   : > { %p10_p0 = scmp.ge.s32.totalorder %s13_s18, 8   ;;  %s1766_s13 = smov %s1306_s25 }
 0x19a   : > { %s1767_s14 = smov %s1224_s16  ;;  %s1768_s15 = smov %s1228_s17 }
 0x19b   : > { %s1769_s16 = smov %s1772_s19  ;;  %s1770_s17 = smov %s1776_s20 }
 0x19c   :  { %12 = sbr.rel (!%p10_p0) target bundleno = 4 (0x4), region = 104 }

// kernel: network_forward.9
= control target key start
LH: loop header
LB: loop body
LE: loop exit
PB: predicated region body
PF: predicated region fallthrough
CT: control target
= control target key end

     0   :  { %s612_s1 = inlined_call_operand.vmem [shape: f32[512,128], index: 1, kind: input, shape index: {}]   ;;  %s613_s0 = inlined_call_operand.vmem [shape: f32[8,512], index: 0, kind: input, shape index: {}]   ;;  %s614_s2 = inlined_call_operand.vmem [shape: f32[1,128], index: 2, kind: input, shape index: {}]   ;;  %s615_s3 = inlined_call_operand.vmem [shape: f32[8,128], index: 3, kind: output, shape index: {}]  }
   0x1   :  { %v40_v0 = vld [vmem:[%s612_s1 + $0x80] sm:$0xff]  ;;  %v41_v1 = vld [vmem:[%s612_s1 + $0x88] sm:$0xff]  ;;  %v42_v11 = vld [vmem:[%s612_s1 + $0x90] sm:$0xff] }
   0x2   :  { %v72_v2 = vld [vmem:[%s612_s1 + $0x180] sm:$0xff]  ;;  %v318_v3 = vpack.c.bf16 %v41_v1, %v40_v0  ;;  %v73_v4 = vld [vmem:[%s612_s1 + $0x188] sm:$0xff]  ;;  %v43_v13 = vld [vmem:[%s612_s1 + $0x98] sm:$0xff] }
   0x3   :  { %v24_v5 = vld [vmem:[%s612_s1] sm:$0xff]  ;;  %v25_v6 = vld [vmem:[%s612_s1 + $0x8] sm:$0xff]  ;;  %v350_v7 = vpack.c.bf16 %v73_v4, %v72_v2  ;;  %v74_v14 = vld [vmem:[%s612_s1 + $0x190] sm:$0xff]  ;;  %v322_v16 = vpack.c.bf16 %v43_v13, %v42_v11 }
   0x4   :  { %v320_v8 = vpack.c.bf16 %v25_v6, %v24_v5  ;;  %v56_v9 = vld [vmem:[%s612_s1 + $0x100] sm:$0xff]  ;;  %v57_v10 = vld [vmem:[%s612_s1 + $0x108] sm:$0xff]  ;;  %319 = vmatprep.subr.bf16.mxu0 %v318_v3  ;;  %v75_v15 = vld [vmem:[%s612_s1 + $0x198] sm:$0xff] }
   0x5   :  { %v352_v12 = vpack.c.bf16 %v57_v10, %v56_v9  ;;  %351 = vmatprep.subr.bf16.mxu1 %v350_v7  ;;  %v354_v17 = vpack.c.bf16 %v75_v15, %v74_v14  ;;  %v26_v18 = vld [vmem:[%s612_s1 + $0x10] sm:$0xff]  ;;  %v27_v19 = vld [vmem:[%s612_s1 + $0x18] sm:$0xff]  ;;  %v44_v23 = vld [vmem:[%s612_s1 + $0xa0] sm:$0xff] }
   0x6   :  { %321 = vmatpush3.bf16.msra.mxu0 %v320_v8  ;;  %v58_v20 = vld [vmem:[%s612_s1 + $0x110] sm:$0xff]  ;;  %v324_v21 = vpack.c.bf16 %v27_v19, %v26_v18  ;;  %v59_v22 = vld [vmem:[%s612_s1 + $0x118] sm:$0xff]  ;;  %v45_v24 = vld [vmem:[%s612_s1 + $0xa8] sm:$0xff] }
   0x7   :  { %353 = vmatpush3.bf16.msra.mxu1 %v352_v12  ;;  %323 = vmatprep.subr.bf16.mxu0 %v322_v16  ;;  %v356_v25 = vpack.c.bf16 %v59_v22, %v58_v20  ;;  %v326_v26 = vpack.c.bf16 %v45_v24, %v44_v23  ;;  %v76_v27 = vld [vmem:[%s612_s1 + $0x1a0] sm:$0xff]  ;;  %v77_v28 = vld [vmem:[%s612_s1 + $0x1a8] sm:$0xff]  ;;  %v46_v35 = vld [vmem:[%s612_s1 + $0xb0] sm:$0xff] }
   0x8   :  { %355 = vmatprep.subr.bf16.mxu1 %v354_v17  ;;  %v28_v29 = vld [vmem:[%s612_s1 + $0x20] sm:$0xff]  ;;  %v358_v30 = vpack.c.bf16 %v77_v28, %v76_v27  ;;  %v29_v31 = vld [vmem:[%s612_s1 + $0x28] sm:$0xff]  ;;  %v47_v36 = vld [vmem:[%s612_s1 + $0xb8] sm:$0xff] }
   0x9   :  { %v60_v32 = vld [vmem:[%s612_s1 + $0x120] sm:$0xff]  ;;  %v61_v33 = vld [vmem:[%s612_s1 + $0x128] sm:$0xff]  ;;  %v328_v34 = vpack.c.bf16 %v29_v31, %v28_v29  ;;  %v78_v37 = vld [vmem:[%s612_s1 + $0x1b0] sm:$0xff]  ;;  %v330_v39 = vpack.c.bf16 %v47_v36, %v46_v35 }
   0xa   :  { %325 = vmatpush3.bf16.msra.mxu0 %v324_v21  ;;  %v360_v38 = vpack.c.bf16 %v61_v33, %v60_v32  ;;  %v79_v40 = vld [vmem:[%s612_s1 + $0x1b8] sm:$0xff]  ;;  %v30_v41 = vld [vmem:[%s612_s1 + $0x30] sm:$0xff]  ;;  %v48_v46 = vld [vmem:[%s612_s1 + $0xc0] sm:$0xff] }
   0xb   :  { %357 = vmatpush3.bf16.msra.mxu1 %v356_v25  ;;  %327 = vmatprep.subr.bf16.mxu0 %v326_v26  ;;  %v31_v42 = vld [vmem:[%s612_s1 + $0x38] sm:$0xff]  ;;  %v362_v43 = vpack.c.bf16 %v79_v40, %v78_v37  ;;  %v62_v44 = vld [vmem:[%s612_s1 + $0x130] sm:$0xff]  ;;  %v49_v47 = vld [vmem:[%s612_s1 + $0xc8] sm:$0xff] }
   0xc   :  { %359 = vmatprep.subr.bf16.mxu1 %v358_v30  ;;  %v63_v45 = vld [vmem:[%s612_s1 + $0x138] sm:$0xff]  ;;  %v80_v48 = vld [vmem:[%s612_s1 + $0x1c0] sm:$0xff]  ;;  %v81_v49 = vld [vmem:[%s612_s1 + $0x1c8] sm:$0xff]  ;;  %v332_v50 = vpack.c.bf16 %v31_v42, %v30_v41  ;;  %v334_v52 = vpack.c.bf16 %v49_v47, %v48_v46 }
   0xd   :  { %v364_v51 = vpack.c.bf16 %v63_v45, %v62_v44  ;;  %v32_v53 = vld [vmem:[%s612_s1 + $0x40] sm:$0xff]  ;;  %v33_v54 = vld [vmem:[%s612_s1 + $0x48] sm:$0xff]  ;;  %v366_v56 = vpack.c.bf16 %v81_v49, %v80_v48  ;;  %v50_v58 = vld [vmem:[%s612_s1 + $0xd0] sm:$0xff] }
   0xe   :  { %329 = vmatpush3.bf16.msra.mxu0 %v328_v34  ;;  %v64_v55 = vld [vmem:[%s612_s1 + $0x140] sm:$0xff]  ;;  %v65_v57 = vld [vmem:[%s612_s1 + $0x148] sm:$0xff]  ;;  %v51_v59 = vld [vmem:[%s612_s1 + $0xd8] sm:$0xff]  ;;  %v336_v62 = vpack.c.bf16 %v33_v54, %v32_v53 }
   0xf   :  { %361 = vmatpush3.bf16.msra.mxu1 %v360_v38  ;;  %331 = vmatprep.subr.bf16.mxu0 %v330_v39  ;;  %v82_v60 = vld [vmem:[%s612_s1 + $0x1d0] sm:$0xff]  ;;  %v83_v61 = vld [vmem:[%s612_s1 + $0x1d8] sm:$0xff]  ;;  %v368_v63 = vpack.c.bf16 %v65_v57, %v64_v55  ;;  %v338_v0 = vpack.c.bf16 %v51_v59, %v50_v58  ;;  %v52_v6 = vld [vmem:[%s612_s1 + $0xe0] sm:$0xff] }
  0x10   :  { %363 = vmatprep.subr.bf16.mxu1 %v362_v43  ;;  %v34_v1 = vld [vmem:[%s612_s1 + $0x50] sm:$0xff]  ;;  %v35_v2 = vld [vmem:[%s612_s1 + $0x58] sm:$0xff]  ;;  %v370_v4 = vpack.c.bf16 %v83_v61, %v82_v60  ;;  %v53_v7 = vld [vmem:[%s612_s1 + $0xe8] sm:$0xff] }
  0x11   :  { %v66_v3 = vld [vmem:[%s612_s1 + $0x150] sm:$0xff]  ;;  %v67_v5 = vld [vmem:[%s612_s1 + $0x158] sm:$0xff]  ;;  %v84_v8 = vld [vmem:[%s612_s1 + $0x1e0] sm:$0xff]  ;;  %v340_v10 = vpack.c.bf16 %v35_v2, %v34_v1  ;;  %v342_v14 = vpack.c.bf16 %v53_v7, %v52_v6 }
  0x12   :  { %333 = vmatpush3.bf16.msra.mxu0 %v332_v50  ;;  %v85_v9 = vld [vmem:[%s612_s1 + $0x1e8] sm:$0xff]  ;;  %v36_v11 = vld [vmem:[%s612_s1 + $0x60] sm:$0xff]  ;;  %v372_v13 = vpack.c.bf16 %v67_v5, %v66_v3  ;;  %v23_v17 = vld [vmem:[%s613_s0 + $0x18] sm:$0xff] }
  0x13   :  { %365 = vmatpush3.bf16.msra.mxu1 %v364_v51  ;;  %335 = vmatprep.subr.bf16.mxu0 %v334_v52  ;;  %v37_v12 = vld [vmem:[%s612_s1 + $0x68] sm:$0xff]  ;;  %v68_v15 = vld [vmem:[%s612_s1 + $0x160] sm:$0xff]  ;;  %v374_v18 = vpack.c.bf16 %v85_v9, %v84_v8  ;;  %v54_v20 = vld [vmem:[%s612_s1 + $0xf0] sm:$0xff] }
  0x14   :  { %367 = vmatprep.subr.bf16.mxu1 %v366_v56  ;;  %v21_v16 = vld [vmem:[%s613_s0 + $0x8] sm:$0xff]  ;;  %v55_v21 = vld [vmem:[%s612_s1 + $0xf8] sm:$0xff]  ;;  %v86_v22 = vld [vmem:[%s612_s1 + $0x1f0] sm:$0xff]  ;;  %222 = vmatprep.mubr.f32.mxu1 %v23_v17  ;;  %v344_v24 = vpack.c.bf16 %v37_v12, %v36_v11 }
  0x15   :  { %v69_v19 = vld [vmem:[%s612_s1 + $0x168] sm:$0xff]  ;;  %152 = vmatprep.mubr.f32.mxu0 %v21_v16  ;;  %v87_v23 = vld [vmem:[%s612_s1 + $0x1f8] sm:$0xff]  ;;  %v346_v26 = vpack.c.bf16 %v55_v21, %v54_v20  ;;  %v38_v27 = vld [vmem:[%s612_s1 + $0x70] sm:$0xff] }
  0x16   :  { %337 = vmatpush3.bf16.msra.mxu0 %v336_v62  ;;  %v376_v25 = vpack.c.bf16 %v69_v19, %v68_v15  ;;  %v39_v28 = vld [vmem:[%s612_s1 + $0x78] sm:$0xff]  ;;  %v378_v29 = vpack.c.bf16 %v87_v23, %v86_v22  ;;  %v70_v30 = vld [vmem:[%s612_s1 + $0x170] sm:$0xff]  ;;  %v20_v34 = vld [vmem:[%s613_s0] sm:$0xff] }
  0x17   :  { %369 = vmatpush3.bf16.msra.mxu1 %v368_v63  ;;  %339 = vmatprep.subr.bf16.mxu0 %v338_v0  ;;  %v71_v31 = vld [vmem:[%s612_s1 + $0x178] sm:$0xff]  ;;  %v348_v32 = vpack.c.bf16 %v39_v28, %v38_v27  ;;  %v22_v35 = vld [vmem:[%s613_s0 + $0x10] sm:$0xff]  ;;  %v247_v42 = vld [vmem:[%s614_s2] ss:$0 sm:$0xff] }
  0x18   :  { %371 = vmatprep.subr.bf16.mxu1 %v370_v4  ;;  %v380_v33 = vpack.c.bf16 %v71_v31, %v70_v30 }
  0x1a   :  { %341 = vmatpush3.bf16.msra.mxu0 %v340_v10 }
  0x1b   :  { %373 = vmatpush3.bf16.msra.mxu1 %v372_v13  ;;  %343 = vmatprep.subr.bf16.mxu0 %v342_v14 }
  0x1c   :  { %375 = vmatprep.subr.bf16.mxu1 %v374_v18 }
  0x1e   :  { %345 = vmatpush3.bf16.msra.mxu0 %v344_v24 }
  0x1f   :  { %377 = vmatpush3.bf16.msra.mxu1 %v376_v25  ;;  %347 = vmatprep.subr.bf16.mxu0 %v346_v26 }
  0x20   :  { %379 = vmatprep.subr.bf16.mxu1 %v378_v29 }
  0x22   :  { %349 = vmatpush3.bf16.msra.mxu0 %v348_v32 }
  0x23   :  { %381 = vmatpush3.bf16.msra.mxu1 %v380_v33 }
  0x25   :  { %153 = vmatmul.mubr.f32.vlgmr.msra.gmra.mrb[0].mxu0 %v20_v34 }
  0x26   :  { %223 = vmatmul.mubr.f32.vlgmr.msra.gmra.mrb[0].mxu1 %v22_v35 }
  0xf8   :  { %v280_v36 = vpop.f32.mrb[0].mxu0 }
  0xf9   :  { %v315_v37 = vpop.f32.mrb[0].mxu1  ;;  %v281_v38 = vpop.f32.mrb[1].mxu0 }
  0xfa   :  { %v282_v39 = vadd.f32 %v281_v38, %v280_v36  ;;  %v316_v40 = vpop.f32.mrb[1].mxu1 }
  0xfb   :  { %v317_v41 = vadd.f32 %v316_v40, %v315_v37 }
  0xfd   :  { %v225_v43 = vadd.f32 %v317_v41, %v282_v39 }
  0xff   :  { %v241_v44 = vadd.f32 %v247_v42, %v225_v43 }
 0x101   :  { %242 = vst [vmem:[%s615_s3] sm:$0xff] %v241_v44 }

</bundles_post_ra>
